<compile_context>
chip_gen: v7x
topology: tpu7x:2x2x1
jax: 0.10.0
libtpu: 0.0.40
codegen_flags: <defaults>
</compile_context>

<pallas_src>
import functools
import math

import jax
import jax.numpy as jnp
from jax.experimental import pallas as pl
from jax.experimental.pallas import tpu as pltpu


# --------------------------------------------------------------------------
# Fused kernel
# --------------------------------------------------------------------------
def _fused_kernel(midx_ref, aidx_ref, *refs, treedef, n_leaves, mashup_num,
                  api_num, n_feat_sets, batch, inv_sqrt_dim):
    f32 = jnp.float32
    n_nodes = mashup_num + api_num
    in_refs = refs[:n_leaves]
    mash_out_ref = refs[n_leaves]
    api_out_ref = refs[n_leaves + 1]
    P = jax.tree_util.tree_unflatten(treedef, in_refs)

    A = P["A"][...]                                               # (N, N)
    feat0 = P["feat_emb"][...]                                    # (N, E)

    # TODO(synk): ALCGNet is not defined in the provided source; substituted by
    # a single linear projection of prepare_embeddings.
    new_api = jnp.dot(P["prepare_emb"][...], P["a_w"][...],
                      preferred_element_type=f32) + P["a_b"][...]  # (A, E)
    new_api_rowsum = jnp.sum(new_api, axis=0, keepdims=True)       # (1, E)

    def attention(former, ap):
        # sum_j (q_i . k_j)/sqrt(d) == q_i . (sum_j k_j / sqrt(d))
        csum = (jnp.sum(former[:mashup_num, :], axis=0, keepdims=True)
                + new_api_rowsum)                                  # (1, in)
        ksum = (jnp.dot(csum, ap["wk"][...], preferred_element_type=f32)
                + float(n_nodes) * ap["bk"][...]) * inv_sqrt_dim   # (1, out)
        q = jnp.dot(former, ap["wq"][...],
                    preferred_element_type=f32) + ap["bq"][...]    # (N, out)
        return jnp.sum(q * ksum, axis=1, keepdims=True)            # (N, 1)

    atts = [attention(feat0, P["f_att"])]
    feats = [feat0]
    x = feat0
    for lp in P["g_layers"]:                                       # unrolled
        former = x
        ax = jnp.dot(A, former, preferred_element_type=f32)        # A @ X (once)
        # (A + I) @ X == ax + former ; second branch is (A @ X) * X.
        part = (jnp.dot(ax + former, lp["w0"][...],
                        preferred_element_type=f32)
                + jnp.dot(ax * former, lp["w1"][...],
                          preferred_element_type=f32)
                + lp["b"][...])
        part = jnp.where(part >= 0.0, part, 0.01 * part)           # LeakyReLU
        ns = jnp.sum(part * part, axis=1, keepdims=True)
        part = part * jax.lax.rsqrt(jnp.maximum(ns, 1e-24))        # F.normalize
        atts.append(attention(former, lp["att"]))
        feats.append(part)
        x = part

    # Softmax over the layer axis; (N,1) values live only in vregs.
    m = atts[0]
    for a in atts[1:]:
        m = jnp.maximum(m, a)
    exps = [jnp.exp(a - m) for a in atts]
    denom = exps[0]
    for e in exps[1:]:
        denom = denom + e
    inv_denom = pl.reciprocal(denom, approx=True)                  # (N, 1) EUP

    # Lane-dense (N, L*E) combine features fed straight into the MLP.
    combine = jnp.concatenate(
        [feats[l] * (exps[l] * inv_denom) for l in range(n_feat_sets)], axis=1)

    def mlp(xv, layers):
        # BN eval scale already folded into the hidden-layer weights/biases.
        n = len(layers)
        for i, lyr in enumerate(layers):
            xv = jnp.dot(xv, lyr["w"][...],
                         preferred_element_type=f32) + lyr["b"][...]
            if i < n - 1:
                xv = jnp.maximum(xv, 0.0)                          # ReLU
        return xv

    check = mlp(combine, P["mlp"])                                 # (N, E)

    # In-kernel gather: one-hot masks from a single vector compare each,
    # realised as MXU selection matmuls.
    midx = midx_ref[...]                                           # (B, 1) i32
    aidx = aidx_ref[...]                                           # (B, 1) i32
    col_n = jax.lax.broadcasted_iota(jnp.int32, (batch, n_nodes), 1)
    col_a = jax.lax.broadcasted_iota(jnp.int32, (batch, api_num), 1)
    sel_m = (col_n == midx).astype(f32)                            # (B, N)
    sel_a = (col_n == (aidx + mashup_num)).astype(f32)             # (B, N)
    sel_na = (col_a == aidx).astype(f32)                           # (B, A)

    mashups = jnp.dot(sel_m, check, preferred_element_type=f32)    # (B, E)
    apis = jnp.dot(sel_a, check, preferred_element_type=f32)       # (B, E)
    n_apis = jnp.dot(sel_na, new_api, preferred_element_type=f32)  # (B, E)

    # bit_gate: raw linear gate -- the reference module applies no activation.
    gate = (jnp.sum(n_apis * P["gate_wn"][...], axis=1, keepdims=True)
            + jnp.sum(apis * P["gate_wa"][...], axis=1, keepdims=True)
            + P["gate_b"][...])                                    # (B, 1)
    api_out = gate * apis + (1.0 - gate) * n_apis
    api_out = mlp(api_out, P["mlp1"])

    mash_out_ref[...] = mashups
    api_out_ref[...] = api_out


# --------------------------------------------------------------------------
# Parameter construction (deterministic, mirrors the PyTorch module layout)
# --------------------------------------------------------------------------
def _init_linear(key, in_dim, out_dim):
    kw, kb = jax.random.split(key)
    bound = 1.0 / math.sqrt(in_dim)
    w = jax.random.uniform(kw, (in_dim, out_dim), jnp.float32, -bound, bound)
    b = jax.random.uniform(kb, (out_dim,), jnp.float32, -bound, bound)
    return w, b


def init_params(key, mashup_num, api_num, embed_num, prepare_dim,
                layer_size, mlp_layer_num, mlp_layer_dim):
    keys = list(jax.random.split(key, 64))
    it = iter(keys)

    def lin(i, o):
        return _init_linear(next(it), i, o)

    params = {}
    bm = math.sqrt(6.0 / (mashup_num + embed_num))     # xavier_uniform_
    params["mashup_emb"] = jax.random.uniform(
        next(it), (mashup_num, embed_num), jnp.float32, -bm, bm)
    ba = math.sqrt(6.0 / (api_num + embed_num))
    params["api_emb"] = jax.random.uniform(
        next(it), (api_num, embed_num), jnp.float32, -ba, ba)
    params["prepare_emb"] = 0.1 * jax.random.normal(
        next(it), (api_num, prepare_dim), jnp.float32)

    # ALCGNet substitute (see TODO in the kernel).
    params["a_w"], params["a_b"] = lin(prepare_dim, embed_num)

    def att_params(i, o):
        wq, bq = lin(i, o)
        wk, bk = lin(i, o)
        return {"wq": wq, "bq": bq, "wk": wk, "bk": bk}

    params["f_att"] = att_params(embed_num, embed_num)

    g_layers = []
    for in_dim, out_dim in zip(layer_size[:-1], layer_size[1:]):
        w0, b0 = lin(in_dim, out_dim)
        w1, b1 = lin(in_dim, out_dim)
        g_layers.append({"w0": w0, "b0": b0, "w1": w1, "b1": b1,
                         "att": att_params(in_dim, out_dim)})
    params["g_layers"] = g_layers

    def mlp_params(input_size):
        layers = []
        for i in range(mlp_layer_num + 1):
            n_in = input_size if i == 0 else mlp_layer_dim
            n_out = mlp_layer_dim if i < mlp_layer_num else embed_num
            layers.append(lin(n_in, n_out))
        return layers

    params["mlp"] = mlp_params(len(layer_size) * embed_num)
    params["mlp1"] = mlp_params(embed_num)
    params["gate_w"], params["gate_b"] = lin(2 * embed_num, 1)
    return params


# --------------------------------------------------------------------------
# Wrapper: parameter prep (fold BN) + single pallas_call
# --------------------------------------------------------------------------
def _prep_kernel_inputs(params, A, embed_num):
    bn_scale = 1.0 / math.sqrt(1.0 + 1e-5)     # BatchNorm1d eval, fresh stats

    def fold_mlp(layers):
        folded = []
        n = len(layers)
        for i, (w, b) in enumerate(layers):
            s = bn_scale if i < n - 1 else 1.0
            folded.append({"w": w * s, "b": (b * s).reshape(1, -1)})
        return folded

    def att(p):
        return {"wq": p["wq"], "bq": p["bq"].reshape(1, -1),
                "wk": p["wk"], "bk": p["bk"].reshape(1, -1)}

    g_layers = [{"w0": lp["w0"], "w1": lp["w1"],
                 "b": (lp["b0"] + lp["b1"]).reshape(1, -1),
                 "att": att(lp["att"])} for lp in params["g_layers"]]

    return {
        "A": A,
        "feat_emb": jnp.concatenate([params["mashup_emb"], params["api_emb"]],
                                    axis=0),
        "prepare_emb": params["prepare_emb"],
        "a_w": params["a_w"],
        "a_b": params["a_b"].reshape(1, -1),
        "f_att": att(params["f_att"]),
        "g_layers": g_layers,
        "mlp": fold_mlp(params["mlp"]),
        "mlp1": fold_mlp(params["mlp1"]),
        "gate_wn": params["gate_w"][:embed_num, :].reshape(1, -1),
        "gate_wa": params["gate_w"][embed_num:, :].reshape(1, -1),
        "gate_b": params["gate_b"].reshape(1, 1),
    }


@functools.partial(jax.jit, static_argnames=("mashup_num", "api_num", "embed_num"))
def maignet_forward(params, A, mashup_index, api_index, *, mashup_num, api_num,
                    embed_num):
    inputs = _prep_kernel_inputs(params, A, embed_num)
    leaves, treedef = jax.tree_util.tree_flatten(inputs)
    n_nodes = mashup_num + api_num
    n_feat_sets = len(params["g_layers"]) + 1
    batch = mashup_index.shape[0]

    midx = mashup_index.astype(jnp.int32).reshape(batch, 1)
    aidx = api_index.astype(jnp.int32).reshape(batch, 1)

    kernel = functools.partial(
        _fused_kernel, treedef=treedef, n_leaves=len(leaves),
        mashup_num=mashup_num, api_num=api_num, n_feat_sets=n_feat_sets,
        batch=batch, inv_sqrt_dim=1.0 / math.sqrt(embed_num))

    # Advisory cost estimate for the fused custom call.
    bytes_accessed = int(sum(l.size * l.dtype.itemsize for l in leaves)
                         + midx.size * 4 + aidx.size * 4
                         + 2 * batch * embed_num * 4)
    flops = 0
    for l in leaves:
        if l.ndim == 2:
            flops += 2 * n_nodes * l.shape[0] * l.shape[1]
    flops += len(params["g_layers"]) * 2 * n_nodes * n_nodes * embed_num
    cost = pl.CostEstimate(flops=int(flops),
                           transcendentals=int(n_nodes * (n_feat_sets + 1)),
                           bytes_accessed=bytes_accessed)

    vmem = pl.BlockSpec(memory_space=pltpu.MemorySpace.VMEM)
    out_shape = (jax.ShapeDtypeStruct((batch, embed_num), jnp.float32),
                 jax.ShapeDtypeStruct((batch, embed_num), jnp.float32))

    mashups, api_output = pl.pallas_call(
        kernel,
        out_shape=out_shape,
        in_specs=[vmem, vmem] + [vmem] * len(leaves),
        out_specs=(vmem, vmem),
        cost_estimate=cost,
    )(midx, aidx, *leaves)
    return mashups, api_output


# --------------------------------------------------------------------------
if __name__ == "__main__":
    mashup_num, api_num, embed_num = 8, 8, 32
    prepare_dim = 16
    layer_size = [32, 32, 32, 32]   # 3 GC layers -> 4 feature sets -> 128-wide combine
    mlp_layer_num, mlp_layer_dim = 2, 64

    key = jax.random.PRNGKey(0)
    kp, ka = jax.random.split(key)
    params = init_params(kp, mashup_num, api_num, embed_num, prepare_dim,
                         layer_size, mlp_layer_num, mlp_layer_dim)

    N = mashup_num + api_num
    r = jax.random.uniform(ka, (mashup_num, api_num), jnp.float32)
    adj = jnp.zeros((N, N), jnp.float32)
    adj = adj.at[:mashup_num, mashup_num:].set(r)
    adj = adj.at[mashup_num:, :mashup_num].set(r.T)
    deg = jnp.sum(adj, axis=1)
    dinv = 1.0 / jnp.sqrt(jnp.maximum(deg, 1e-8))
    A = adj * dinv[:, None] * dinv[None, :]        # normalized adjacency (dense)

    mashup_index = jnp.array([0, 1, 2, 3], dtype=jnp.int32)
    api_index = jnp.array([0, 2, 4, 6], dtype=jnp.int32)

    mashups, api_output = maignet_forward(
        params, A, mashup_index, api_index,
        mashup_num=mashup_num, api_num=api_num, embed_num=embed_num)
    jax.block_until_ready((mashups, api_output))
    assert mashups.shape == (4, embed_num) and api_output.shape == (4, embed_num)
    assert bool(jnp.all(jnp.isfinite(mashups)))
    assert bool(jnp.all(jnp.isfinite(api_output)))
    print("KERNEL_OK")
</pallas_src>

<mosaic_0001>
module attributes {stable_mosaic.version = 11 : i64} {
  func.func @_fused_kernel(%arg0: memref<4x1xi32, #tpu.memory_space<vmem>>, %arg1: memref<4x1xi32, #tpu.memory_space<vmem>>, %arg2: memref<16x16xf32, #tpu.memory_space<vmem>>, %arg3: memref<1x32xf32, #tpu.memory_space<vmem>>, %arg4: memref<16x32xf32, #tpu.memory_space<vmem>>, %arg5: memref<1x32xf32, #tpu.memory_space<vmem>>, %arg6: memref<1x32xf32, #tpu.memory_space<vmem>>, %arg7: memref<32x32xf32, #tpu.memory_space<vmem>>, %arg8: memref<32x32xf32, #tpu.memory_space<vmem>>, %arg9: memref<16x32xf32, #tpu.memory_space<vmem>>, %arg10: memref<1x32xf32, #tpu.memory_space<vmem>>, %arg11: memref<1x32xf32, #tpu.memory_space<vmem>>, %arg12: memref<32x32xf32, #tpu.memory_space<vmem>>, %arg13: memref<32x32xf32, #tpu.memory_space<vmem>>, %arg14: memref<1x32xf32, #tpu.memory_space<vmem>>, %arg15: memref<32x32xf32, #tpu.memory_space<vmem>>, %arg16: memref<32x32xf32, #tpu.memory_space<vmem>>, %arg17: memref<1x32xf32, #tpu.memory_space<vmem>>, %arg18: memref<1x32xf32, #tpu.memory_space<vmem>>, %arg19: memref<32x32xf32, #tpu.memory_space<vmem>>, %arg20: memref<32x32xf32, #tpu.memory_space<vmem>>, %arg21: memref<1x32xf32, #tpu.memory_space<vmem>>, %arg22: memref<32x32xf32, #tpu.memory_space<vmem>>, %arg23: memref<32x32xf32, #tpu.memory_space<vmem>>, %arg24: memref<1x32xf32, #tpu.memory_space<vmem>>, %arg25: memref<1x32xf32, #tpu.memory_space<vmem>>, %arg26: memref<32x32xf32, #tpu.memory_space<vmem>>, %arg27: memref<32x32xf32, #tpu.memory_space<vmem>>, %arg28: memref<1x32xf32, #tpu.memory_space<vmem>>, %arg29: memref<32x32xf32, #tpu.memory_space<vmem>>, %arg30: memref<32x32xf32, #tpu.memory_space<vmem>>, %arg31: memref<1x1xf32, #tpu.memory_space<vmem>>, %arg32: memref<1x32xf32, #tpu.memory_space<vmem>>, %arg33: memref<1x32xf32, #tpu.memory_space<vmem>>, %arg34: memref<1x64xf32, #tpu.memory_space<vmem>>, %arg35: memref<128x64xf32, #tpu.memory_space<vmem>>, %arg36: memref<1x64xf32, #tpu.memory_space<vmem>>, %arg37: memref<64x64xf32, #tpu.memory_space<vmem>>, %arg38: memref<1x32xf32, #tpu.memory_space<vmem>>, %arg39: memref<64x32xf32, #tpu.memory_space<vmem>>, %arg40: memref<1x64xf32, #tpu.memory_space<vmem>>, %arg41: memref<32x64xf32, #tpu.memory_space<vmem>>, %arg42: memref<1x64xf32, #tpu.memory_space<vmem>>, %arg43: memref<64x64xf32, #tpu.memory_space<vmem>>, %arg44: memref<1x32xf32, #tpu.memory_space<vmem>>, %arg45: memref<64x32xf32, #tpu.memory_space<vmem>>, %arg46: memref<8x16xf32, #tpu.memory_space<vmem>>, %arg47: memref<4x32xf32, #tpu.memory_space<vmem>>, %arg48: memref<4x32xf32, #tpu.memory_space<vmem>>) attributes {dimension_semantics = [], scalar_prefetch = 0 : i64, scratch_operands = 0 : i64, tpu.core_type = #tpu.core_type<tc>} {
    %c0 = arith.constant 0 : index
    %c0_0 = arith.constant 0 : index
    %0 = vector.load %arg2[%c0, %c0_0] : memref<16x16xf32, #tpu.memory_space<vmem>>, vector<16x16xf32>
    %c0_1 = arith.constant 0 : index
    %c0_2 = arith.constant 0 : index
    %1 = vector.load %arg9[%c0_1, %c0_2] : memref<16x32xf32, #tpu.memory_space<vmem>>, vector<16x32xf32>
    %c0_3 = arith.constant 0 : index
    %c0_4 = arith.constant 0 : index
    %2 = vector.load %arg46[%c0_3, %c0_4] : memref<8x16xf32, #tpu.memory_space<vmem>>, vector<8x16xf32>
    %c0_5 = arith.constant 0 : index
    %c0_6 = arith.constant 0 : index
    %3 = vector.load %arg4[%c0_5, %c0_6] : memref<16x32xf32, #tpu.memory_space<vmem>>, vector<16x32xf32>
    %cst = arith.constant dense<0.000000e+00> : vector<8x32xf32>
    %4 = tpu.matmul %2, %3, %cst {dimension_numbers = #tpu.dot_dimension_numbers<[1], [0], [0], [1], [0, 0, 1, 1], [], []>} : vector<8x16xf32>, vector<16x32xf32>, vector<8x32xf32> -> vector<8x32xf32>
    %c0_7 = arith.constant 0 : index
    %c0_8 = arith.constant 0 : index
    %5 = vector.load %arg3[%c0_7, %c0_8] : memref<1x32xf32, #tpu.memory_space<vmem>>, vector<1x32xf32>
    %6 = vector.broadcast %5 : vector<1x32xf32> to vector<8x32xf32>
    %7 = arith.addf %4, %6 : vector<8x32xf32>
    %cst_9 = arith.constant dense<0.000000e+00> : vector<32xf32>
    %8 = vector.multi_reduction <add>, %7, %cst_9 [0] : vector<8x32xf32> to vector<32xf32>
    %9 = vector.shape_cast %8 : vector<32xf32> to vector<1x32xf32>
    %10 = vector.extract_strided_slice %1 {offsets = [0, 0], sizes = [8, 32], strides = [1, 1]} : vector<16x32xf32> to vector<8x32xf32>
    %cst_10 = arith.constant dense<0.000000e+00> : vector<32xf32>
    %11 = vector.multi_reduction <add>, %10, %cst_10 [0] : vector<8x32xf32> to vector<32xf32>
    %12 = vector.shape_cast %11 : vector<32xf32> to vector<1x32xf32>
    %13 = arith.addf %12, %9 : vector<1x32xf32>
    %c0_11 = arith.constant 0 : index
    %c0_12 = arith.constant 0 : index
    %14 = vector.load %arg7[%c0_11, %c0_12] : memref<32x32xf32, #tpu.memory_space<vmem>>, vector<32x32xf32>
    %cst_13 = arith.constant dense<0.000000e+00> : vector<1x32xf32>
    %15 = tpu.matmul %13, %14, %cst_13 {dimension_numbers = #tpu.dot_dimension_numbers<[1], [0], [0], [1], [0, 0, 1, 1], [], []>} : vector<1x32xf32>, vector<32x32xf32>, vector<1x32xf32> -> vector<1x32xf32>
    %c0_14 = arith.constant 0 : index
    %c0_15 = arith.constant 0 : index
    %16 = vector.load %arg5[%c0_14, %c0_15] : memref<1x32xf32, #tpu.memory_space<vmem>>, vector<1x32xf32>
    %cst_16 = arith.constant 1.600000e+01 : f32
    %17 = vector.broadcast %cst_16 : f32 to vector<1x32xf32>
    %18 = arith.mulf %17, %16 : vector<1x32xf32>
    %19 = arith.addf %15, %18 : vector<1x32xf32>
    %cst_17 = arith.constant 0.176776692 : f32
    %20 = vector.broadcast %cst_17 : f32 to vector<1x32xf32>
    %21 = arith.mulf %19, %20 : vector<1x32xf32>
    %c0_18 = arith.constant 0 : index
    %c0_19 = arith.constant 0 : index
    %22 = vector.load %arg8[%c0_18, %c0_19] : memref<32x32xf32, #tpu.memory_space<vmem>>, vector<32x32xf32>
    %cst_20 = arith.constant dense<0.000000e+00> : vector<16x32xf32>
    %23 = tpu.matmul %1, %22, %cst_20 {dimension_numbers = #tpu.dot_dimension_numbers<[1], [0], [0], [1], [0, 0, 1, 1], [], []>} : vector<16x32xf32>, vector<32x32xf32>, vector<16x32xf32> -> vector<16x32xf32>
    %c0_21 = arith.constant 0 : index
    %c0_22 = arith.constant 0 : index
    %24 = vector.load %arg6[%c0_21, %c0_22] : memref<1x32xf32, #tpu.memory_space<vmem>>, vector<1x32xf32>
    %25 = vector.broadcast %24 : vector<1x32xf32> to vector<16x32xf32>
    %26 = arith.addf %23, %25 : vector<16x32xf32>
    %27 = vector.broadcast %21 : vector<1x32xf32> to vector<16x32xf32>
    %28 = arith.mulf %26, %27 : vector<16x32xf32>
    %cst_23 = arith.constant dense<0.000000e+00> : vector<16xf32>
    %29 = vector.multi_reduction <add>, %28, %cst_23 [1] : vector<16x32xf32> to vector<16xf32>
    %30 = vector.shape_cast %29 : vector<16xf32> to vector<16x1xf32>
    %cst_24 = arith.constant dense<0.000000e+00> : vector<16x32xf32>
    %31 = tpu.matmul %0, %1, %cst_24 {dimension_numbers = #tpu.dot_dimension_numbers<[1], [0], [0], [1], [0, 0, 1, 1], [], []>} : vector<16x16xf32>, vector<16x32xf32>, vector<16x32xf32> -> vector<16x32xf32>
    %32 = arith.addf %31, %1 : vector<16x32xf32>
    %c0_25 = arith.constant 0 : index
    %c0_26 = arith.constant 0 : index
    %33 = vector.load %arg15[%c0_25, %c0_26] : memref<32x32xf32, #tpu.memory_space<vmem>>, vector<32x32xf32>
    %cst_27 = arith.constant dense<0.000000e+00> : vector<16x32xf32>
    %34 = tpu.matmul %32, %33, %cst_27 {dimension_numbers = #tpu.dot_dimension_numbers<[1], [0], [0], [1], [0, 0, 1, 1], [], []>} : vector<16x32xf32>, vector<32x32xf32>, vector<16x32xf32> -> vector<16x32xf32>
    %35 = arith.mulf %31, %1 : vector<16x32xf32>
    %c0_28 = arith.constant 0 : index
    %c0_29 = arith.constant 0 : index
    %36 = vector.load %arg16[%c0_28, %c0_29] : memref<32x32xf32, #tpu.memory_space<vmem>>, vector<32x32xf32>
    %cst_30 = arith.constant dense<0.000000e+00> : vector<16x32xf32>
    %37 = tpu.matmul %35, %36, %cst_30 {dimension_numbers = #tpu.dot_dimension_numbers<[1], [0], [0], [1], [0, 0, 1, 1], [], []>} : vector<16x32xf32>, vector<32x32xf32>, vector<16x32xf32> -> vector<16x32xf32>
    %38 = arith.addf %34, %37 : vector<16x32xf32>
    %c0_31 = arith.constant 0 : index
    %c0_32 = arith.constant 0 : index
    %39 = vector.load %arg14[%c0_31, %c0_32] : memref<1x32xf32, #tpu.memory_space<vmem>>, vector<1x32xf32>
    %40 = vector.broadcast %39 : vector<1x32xf32> to vector<16x32xf32>
    %41 = arith.addf %38, %40 : vector<16x32xf32>
    %cst_33 = arith.constant 0.000000e+00 : f32
    %42 = vector.broadcast %cst_33 : f32 to vector<16x32xf32>
    %43 = arith.cmpf oge, %41, %42 : vector<16x32xf32>
    %cst_34 = arith.constant 0.00999999977 : f32
    %44 = vector.broadcast %cst_34 : f32 to vector<16x32xf32>
    %45 = arith.mulf %44, %41 : vector<16x32xf32>
    %46 = arith.select %43, %41, %45 : vector<16x32xi1>, vector<16x32xf32>
    %47 = arith.mulf %46, %46 : vector<16x32xf32>
    %cst_35 = arith.constant dense<0.000000e+00> : vector<16xf32>
    %48 = vector.multi_reduction <add>, %47, %cst_35 [1] : vector<16x32xf32> to vector<16xf32>
    %49 = vector.shape_cast %48 : vector<16xf32> to vector<16x1xf32>
    %cst_36 = arith.constant 1.000000e-24 : f32
    %50 = vector.broadcast %cst_36 : f32 to vector<16x1xf32>
    %51 = arith.maximumf %49, %50 : vector<16x1xf32>
    %52 = math.rsqrt %51 : vector<16x1xf32>
    %53 = vector.broadcast %52 : vector<16x1xf32> to vector<16x32xf32>
    %54 = arith.mulf %46, %53 : vector<16x32xf32>
    %55 = vector.extract_strided_slice %1 {offsets = [0, 0], sizes = [8, 32], strides = [1, 1]} : vector<16x32xf32> to vector<8x32xf32>
    %cst_37 = arith.constant dense<0.000000e+00> : vector<32xf32>
    %56 = vector.multi_reduction <add>, %55, %cst_37 [0] : vector<8x32xf32> to vector<32xf32>
    %57 = vector.shape_cast %56 : vector<32xf32> to vector<1x32xf32>
    %58 = arith.addf %57, %9 : vector<1x32xf32>
    %c0_38 = arith.constant 0 : index
    %c0_39 = arith.constant 0 : index
    %59 = vector.load %arg12[%c0_38, %c0_39] : memref<32x32xf32, #tpu.memory_space<vmem>>, vector<32x32xf32>
    %cst_40 = arith.constant dense<0.000000e+00> : vector<1x32xf32>
    %60 = tpu.matmul %58, %59, %cst_40 {dimension_numbers = #tpu.dot_dimension_numbers<[1], [0], [0], [1], [0, 0, 1, 1], [], []>} : vector<1x32xf32>, vector<32x32xf32>, vector<1x32xf32> -> vector<1x32xf32>
    %c0_41 = arith.constant 0 : index
    %c0_42 = arith.constant 0 : index
    %61 = vector.load %arg10[%c0_41, %c0_42] : memref<1x32xf32, #tpu.memory_space<vmem>>, vector<1x32xf32>
    %cst_43 = arith.constant 1.600000e+01 : f32
    %62 = vector.broadcast %cst_43 : f32 to vector<1x32xf32>
    %63 = arith.mulf %62, %61 : vector<1x32xf32>
    %64 = arith.addf %60, %63 : vector<1x32xf32>
    %cst_44 = arith.constant 0.176776692 : f32
    %65 = vector.broadcast %cst_44 : f32 to vector<1x32xf32>
    %66 = arith.mulf %64, %65 : vector<1x32xf32>
    %c0_45 = arith.constant 0 : index
    %c0_46 = arith.constant 0 : index
    %67 = vector.load %arg13[%c0_45, %c0_46] : memref<32x32xf32, #tpu.memory_space<vmem>>, vector<32x32xf32>
    %cst_47 = arith.constant dense<0.000000e+00> : vector<16x32xf32>
    %68 = tpu.matmul %1, %67, %cst_47 {dimension_numbers = #tpu.dot_dimension_numbers<[1], [0], [0], [1], [0, 0, 1, 1], [], []>} : vector<16x32xf32>, vector<32x32xf32>, vector<16x32xf32> -> vector<16x32xf32>
    %c0_48 = arith.constant 0 : index
    %c0_49 = arith.constant 0 : index
    %69 = vector.load %arg11[%c0_48, %c0_49] : memref<1x32xf32, #tpu.memory_space<vmem>>, vector<1x32xf32>
    %70 = vector.broadcast %69 : vector<1x32xf32> to vector<16x32xf32>
    %71 = arith.addf %68, %70 : vector<16x32xf32>
    %72 = vector.broadcast %66 : vector<1x32xf32> to vector<16x32xf32>
    %73 = arith.mulf %71, %72 : vector<16x32xf32>
    %cst_50 = arith.constant dense<0.000000e+00> : vector<16xf32>
    %74 = vector.multi_reduction <add>, %73, %cst_50 [1] : vector<16x32xf32> to vector<16xf32>
    %75 = vector.shape_cast %74 : vector<16xf32> to vector<16x1xf32>
    %cst_51 = arith.constant dense<0.000000e+00> : vector<16x32xf32>
    %76 = tpu.matmul %0, %54, %cst_51 {dimension_numbers = #tpu.dot_dimension_numbers<[1], [0], [0], [1], [0, 0, 1, 1], [], []>} : vector<16x16xf32>, vector<16x32xf32>, vector<16x32xf32> -> vector<16x32xf32>
    %77 = arith.addf %76, %54 : vector<16x32xf32>
    %c0_52 = arith.constant 0 : index
    %c0_53 = arith.constant 0 : index
    %78 = vector.load %arg22[%c0_52, %c0_53] : memref<32x32xf32, #tpu.memory_space<vmem>>, vector<32x32xf32>
    %cst_54 = arith.constant dense<0.000000e+00> : vector<16x32xf32>
    %79 = tpu.matmul %77, %78, %cst_54 {dimension_numbers = #tpu.dot_dimension_numbers<[1], [0], [0], [1], [0, 0, 1, 1], [], []>} : vector<16x32xf32>, vector<32x32xf32>, vector<16x32xf32> -> vector<16x32xf32>
    %80 = arith.mulf %76, %54 : vector<16x32xf32>
    %c0_55 = arith.constant 0 : index
    %c0_56 = arith.constant 0 : index
    %81 = vector.load %arg23[%c0_55, %c0_56] : memref<32x32xf32, #tpu.memory_space<vmem>>, vector<32x32xf32>
    %cst_57 = arith.constant dense<0.000000e+00> : vector<16x32xf32>
    %82 = tpu.matmul %80, %81, %cst_57 {dimension_numbers = #tpu.dot_dimension_numbers<[1], [0], [0], [1], [0, 0, 1, 1], [], []>} : vector<16x32xf32>, vector<32x32xf32>, vector<16x32xf32> -> vector<16x32xf32>
    %83 = arith.addf %79, %82 : vector<16x32xf32>
    %c0_58 = arith.constant 0 : index
    %c0_59 = arith.constant 0 : index
    %84 = vector.load %arg21[%c0_58, %c0_59] : memref<1x32xf32, #tpu.memory_space<vmem>>, vector<1x32xf32>
    %85 = vector.broadcast %84 : vector<1x32xf32> to vector<16x32xf32>
    %86 = arith.addf %83, %85 : vector<16x32xf32>
    %cst_60 = arith.constant 0.000000e+00 : f32
    %87 = vector.broadcast %cst_60 : f32 to vector<16x32xf32>
    %88 = arith.cmpf oge, %86, %87 : vector<16x32xf32>
    %cst_61 = arith.constant 0.00999999977 : f32
    %89 = vector.broadcast %cst_61 : f32 to vector<16x32xf32>
    %90 = arith.mulf %89, %86 : vector<16x32xf32>
    %91 = arith.select %88, %86, %90 : vector<16x32xi1>, vector<16x32xf32>
    %92 = arith.mulf %91, %91 : vector<16x32xf32>
    %cst_62 = arith.constant dense<0.000000e+00> : vector<16xf32>
    %93 = vector.multi_reduction <add>, %92, %cst_62 [1] : vector<16x32xf32> to vector<16xf32>
    %94 = vector.shape_cast %93 : vector<16xf32> to vector<16x1xf32>
    %cst_63 = arith.constant 1.000000e-24 : f32
    %95 = vector.broadcast %cst_63 : f32 to vector<16x1xf32>
    %96 = arith.maximumf %94, %95 : vector<16x1xf32>
    %97 = math.rsqrt %96 : vector<16x1xf32>
    %98 = vector.broadcast %97 : vector<16x1xf32> to vector<16x32xf32>
    %99 = arith.mulf %91, %98 : vector<16x32xf32>
    %100 = vector.extract_strided_slice %54 {offsets = [0, 0], sizes = [8, 32], strides = [1, 1]} : vector<16x32xf32> to vector<8x32xf32>
    %cst_64 = arith.constant dense<0.000000e+00> : vector<32xf32>
    %101 = vector.multi_reduction <add>, %100, %cst_64 [0] : vector<8x32xf32> to vector<32xf32>
    %102 = vector.shape_cast %101 : vector<32xf32> to vector<1x32xf32>
    %103 = arith.addf %102, %9 : vector<1x32xf32>
    %c0_65 = arith.constant 0 : index
    %c0_66 = arith.constant 0 : index
    %104 = vector.load %arg19[%c0_65, %c0_66] : memref<32x32xf32, #tpu.memory_space<vmem>>, vector<32x32xf32>
    %cst_67 = arith.constant dense<0.000000e+00> : vector<1x32xf32>
    %105 = tpu.matmul %103, %104, %cst_67 {dimension_numbers = #tpu.dot_dimension_numbers<[1], [0], [0], [1], [0, 0, 1, 1], [], []>} : vector<1x32xf32>, vector<32x32xf32>, vector<1x32xf32> -> vector<1x32xf32>
    %c0_68 = arith.constant 0 : index
    %c0_69 = arith.constant 0 : index
    %106 = vector.load %arg17[%c0_68, %c0_69] : memref<1x32xf32, #tpu.memory_space<vmem>>, vector<1x32xf32>
    %cst_70 = arith.constant 1.600000e+01 : f32
    %107 = vector.broadcast %cst_70 : f32 to vector<1x32xf32>
    %108 = arith.mulf %107, %106 : vector<1x32xf32>
    %109 = arith.addf %105, %108 : vector<1x32xf32>
    %cst_71 = arith.constant 0.176776692 : f32
    %110 = vector.broadcast %cst_71 : f32 to vector<1x32xf32>
    %111 = arith.mulf %109, %110 : vector<1x32xf32>
    %c0_72 = arith.constant 0 : index
    %c0_73 = arith.constant 0 : index
    %112 = vector.load %arg20[%c0_72, %c0_73] : memref<32x32xf32, #tpu.memory_space<vmem>>, vector<32x32xf32>
    %cst_74 = arith.constant dense<0.000000e+00> : vector<16x32xf32>
    %113 = tpu.matmul %54, %112, %cst_74 {dimension_numbers = #tpu.dot_dimension_numbers<[1], [0], [0], [1], [0, 0, 1, 1], [], []>} : vector<16x32xf32>, vector<32x32xf32>, vector<16x32xf32> -> vector<16x32xf32>
    %c0_75 = arith.constant 0 : index
    %c0_76 = arith.constant 0 : index
    %114 = vector.load %arg18[%c0_75, %c0_76] : memref<1x32xf32, #tpu.memory_space<vmem>>, vector<1x32xf32>
    %115 = vector.broadcast %114 : vector<1x32xf32> to vector<16x32xf32>
    %116 = arith.addf %113, %115 : vector<16x32xf32>
    %117 = vector.broadcast %111 : vector<1x32xf32> to vector<16x32xf32>
    %118 = arith.mulf %116, %117 : vector<16x32xf32>
    %cst_77 = arith.constant dense<0.000000e+00> : vector<16xf32>
    %119 = vector.multi_reduction <add>, %118, %cst_77 [1] : vector<16x32xf32> to vector<16xf32>
    %120 = vector.shape_cast %119 : vector<16xf32> to vector<16x1xf32>
    %cst_78 = arith.constant dense<0.000000e+00> : vector<16x32xf32>
    %121 = tpu.matmul %0, %99, %cst_78 {dimension_numbers = #tpu.dot_dimension_numbers<[1], [0], [0], [1], [0, 0, 1, 1], [], []>} : vector<16x16xf32>, vector<16x32xf32>, vector<16x32xf32> -> vector<16x32xf32>
    %122 = arith.addf %121, %99 : vector<16x32xf32>
    %c0_79 = arith.constant 0 : index
    %c0_80 = arith.constant 0 : index
    %123 = vector.load %arg29[%c0_79, %c0_80] : memref<32x32xf32, #tpu.memory_space<vmem>>, vector<32x32xf32>
    %cst_81 = arith.constant dense<0.000000e+00> : vector<16x32xf32>
    %124 = tpu.matmul %122, %123, %cst_81 {dimension_numbers = #tpu.dot_dimension_numbers<[1], [0], [0], [1], [0, 0, 1, 1], [], []>} : vector<16x32xf32>, vector<32x32xf32>, vector<16x32xf32> -> vector<16x32xf32>
    %125 = arith.mulf %121, %99 : vector<16x32xf32>
    %c0_82 = arith.constant 0 : index
    %c0_83 = arith.constant 0 : index
    %126 = vector.load %arg30[%c0_82, %c0_83] : memref<32x32xf32, #tpu.memory_space<vmem>>, vector<32x32xf32>
    %cst_84 = arith.constant dense<0.000000e+00> : vector<16x32xf32>
    %127 = tpu.matmul %125, %126, %cst_84 {dimension_numbers = #tpu.dot_dimension_numbers<[1], [0], [0], [1], [0, 0, 1, 1], [], []>} : vector<16x32xf32>, vector<32x32xf32>, vector<16x32xf32> -> vector<16x32xf32>
    %128 = arith.addf %124, %127 : vector<16x32xf32>
    %c0_85 = arith.constant 0 : index
    %c0_86 = arith.constant 0 : index
    %129 = vector.load %arg28[%c0_85, %c0_86] : memref<1x32xf32, #tpu.memory_space<vmem>>, vector<1x32xf32>
    %130 = vector.broadcast %129 : vector<1x32xf32> to vector<16x32xf32>
    %131 = arith.addf %128, %130 : vector<16x32xf32>
    %cst_87 = arith.constant 0.000000e+00 : f32
    %132 = vector.broadcast %cst_87 : f32 to vector<16x32xf32>
    %133 = arith.cmpf oge, %131, %132 : vector<16x32xf32>
    %cst_88 = arith.constant 0.00999999977 : f32
    %134 = vector.broadcast %cst_88 : f32 to vector<16x32xf32>
    %135 = arith.mulf %134, %131 : vector<16x32xf32>
    %136 = arith.select %133, %131, %135 : vector<16x32xi1>, vector<16x32xf32>
    %137 = arith.mulf %136, %136 : vector<16x32xf32>
    %cst_89 = arith.constant dense<0.000000e+00> : vector<16xf32>
    %138 = vector.multi_reduction <add>, %137, %cst_89 [1] : vector<16x32xf32> to vector<16xf32>
    %139 = vector.shape_cast %138 : vector<16xf32> to vector<16x1xf32>
    %cst_90 = arith.constant 1.000000e-24 : f32
    %140 = vector.broadcast %cst_90 : f32 to vector<16x1xf32>
    %141 = arith.maximumf %139, %140 : vector<16x1xf32>
    %142 = math.rsqrt %141 : vector<16x1xf32>
    %143 = vector.broadcast %142 : vector<16x1xf32> to vector<16x32xf32>
    %144 = arith.mulf %136, %143 : vector<16x32xf32>
    %145 = vector.extract_strided_slice %99 {offsets = [0, 0], sizes = [8, 32], strides = [1, 1]} : vector<16x32xf32> to vector<8x32xf32>
    %cst_91 = arith.constant dense<0.000000e+00> : vector<32xf32>
    %146 = vector.multi_reduction <add>, %145, %cst_91 [0] : vector<8x32xf32> to vector<32xf32>
    %147 = vector.shape_cast %146 : vector<32xf32> to vector<1x32xf32>
    %148 = arith.addf %147, %9 : vector<1x32xf32>
    %c0_92 = arith.constant 0 : index
    %c0_93 = arith.constant 0 : index
    %149 = vector.load %arg26[%c0_92, %c0_93] : memref<32x32xf32, #tpu.memory_space<vmem>>, vector<32x32xf32>
    %cst_94 = arith.constant dense<0.000000e+00> : vector<1x32xf32>
    %150 = tpu.matmul %148, %149, %cst_94 {dimension_numbers = #tpu.dot_dimension_numbers<[1], [0], [0], [1], [0, 0, 1, 1], [], []>} : vector<1x32xf32>, vector<32x32xf32>, vector<1x32xf32> -> vector<1x32xf32>
    %c0_95 = arith.constant 0 : index
    %c0_96 = arith.constant 0 : index
    %151 = vector.load %arg24[%c0_95, %c0_96] : memref<1x32xf32, #tpu.memory_space<vmem>>, vector<1x32xf32>
    %cst_97 = arith.constant 1.600000e+01 : f32
    %152 = vector.broadcast %cst_97 : f32 to vector<1x32xf32>
    %153 = arith.mulf %152, %151 : vector<1x32xf32>
    %154 = arith.addf %150, %153 : vector<1x32xf32>
    %cst_98 = arith.constant 0.176776692 : f32
    %155 = vector.broadcast %cst_98 : f32 to vector<1x32xf32>
    %156 = arith.mulf %154, %155 : vector<1x32xf32>
    %c0_99 = arith.constant 0 : index
    %c0_100 = arith.constant 0 : index
    %157 = vector.load %arg27[%c0_99, %c0_100] : memref<32x32xf32, #tpu.memory_space<vmem>>, vector<32x32xf32>
    %cst_101 = arith.constant dense<0.000000e+00> : vector<16x32xf32>
    %158 = tpu.matmul %99, %157, %cst_101 {dimension_numbers = #tpu.dot_dimension_numbers<[1], [0], [0], [1], [0, 0, 1, 1], [], []>} : vector<16x32xf32>, vector<32x32xf32>, vector<16x32xf32> -> vector<16x32xf32>
    %c0_102 = arith.constant 0 : index
    %c0_103 = arith.constant 0 : index
    %159 = vector.load %arg25[%c0_102, %c0_103] : memref<1x32xf32, #tpu.memory_space<vmem>>, vector<1x32xf32>
    %160 = vector.broadcast %159 : vector<1x32xf32> to vector<16x32xf32>
    %161 = arith.addf %158, %160 : vector<16x32xf32>
    %162 = vector.broadcast %156 : vector<1x32xf32> to vector<16x32xf32>
    %163 = arith.mulf %161, %162 : vector<16x32xf32>
    %cst_104 = arith.constant dense<0.000000e+00> : vector<16xf32>
    %164 = vector.multi_reduction <add>, %163, %cst_104 [1] : vector<16x32xf32> to vector<16xf32>
    %165 = vector.shape_cast %164 : vector<16xf32> to vector<16x1xf32>
    %166 = arith.maximumf %30, %75 : vector<16x1xf32>
    %167 = arith.maximumf %166, %120 : vector<16x1xf32>
    %168 = arith.maximumf %167, %165 : vector<16x1xf32>
    %169 = arith.subf %30, %168 : vector<16x1xf32>
    %170 = math.exp %169 : vector<16x1xf32>
    %171 = arith.subf %75, %168 : vector<16x1xf32>
    %172 = math.exp %171 : vector<16x1xf32>
    %173 = arith.subf %120, %168 : vector<16x1xf32>
    %174 = math.exp %173 : vector<16x1xf32>
    %175 = arith.subf %165, %168 : vector<16x1xf32>
    %176 = math.exp %175 : vector<16x1xf32>
    %177 = arith.addf %170, %172 : vector<16x1xf32>
    %178 = arith.addf %177, %174 : vector<16x1xf32>
    %179 = arith.addf %178, %176 : vector<16x1xf32>
    %180 = tpu.reciprocal %179 {approx = true} : vector<16x1xf32> -> vector<16x1xf32>
    %181 = arith.mulf %170, %180 : vector<16x1xf32>
    %182 = vector.broadcast %181 : vector<16x1xf32> to vector<16x32xf32>
    %183 = arith.mulf %1, %182 : vector<16x32xf32>
    %184 = arith.mulf %172, %180 : vector<16x1xf32>
    %185 = vector.broadcast %184 : vector<16x1xf32> to vector<16x32xf32>
    %186 = arith.mulf %54, %185 : vector<16x32xf32>
    %187 = arith.mulf %174, %180 : vector<16x1xf32>
    %188 = vector.broadcast %187 : vector<16x1xf32> to vector<16x32xf32>
    %189 = arith.mulf %99, %188 : vector<16x32xf32>
    %190 = arith.mulf %176, %180 : vector<16x1xf32>
    %191 = vector.broadcast %190 : vector<16x1xf32> to vector<16x32xf32>
    %192 = arith.mulf %144, %191 : vector<16x32xf32>
    %193 = tpu.concatenate %183, %186, %189, %192 in 1 : vector<16x32xf32>, vector<16x32xf32>, vector<16x32xf32>, vector<16x32xf32> -> vector<16x128xf32>
    %c0_105 = arith.constant 0 : index
    %c0_106 = arith.constant 0 : index
    %194 = vector.load %arg35[%c0_105, %c0_106] : memref<128x64xf32, #tpu.memory_space<vmem>>, vector<128x64xf32>
    %cst_107 = arith.constant dense<0.000000e+00> : vector<16x64xf32>
    %195 = tpu.matmul %193, %194, %cst_107 {dimension_numbers = #tpu.dot_dimension_numbers<[1], [0], [0], [1], [0, 0, 1, 1], [], []>} : vector<16x128xf32>, vector<128x64xf32>, vector<16x64xf32> -> vector<16x64xf32>
    %c0_108 = arith.constant 0 : index
    %c0_109 = arith.constant 0 : index
    %196 = vector.load %arg34[%c0_108, %c0_109] : memref<1x64xf32, #tpu.memory_space<vmem>>, vector<1x64xf32>
    %197 = vector.broadcast %196 : vector<1x64xf32> to vector<16x64xf32>
    %198 = arith.addf %195, %197 : vector<16x64xf32>
    %cst_110 = arith.constant 0.000000e+00 : f32
    %199 = vector.broadcast %cst_110 : f32 to vector<16x64xf32>
    %200 = arith.maximumf %198, %199 : vector<16x64xf32>
    %c0_111 = arith.constant 0 : index
    %c0_112 = arith.constant 0 : index
    %201 = vector.load %arg37[%c0_111, %c0_112] : memref<64x64xf32, #tpu.memory_space<vmem>>, vector<64x64xf32>
    %cst_113 = arith.constant dense<0.000000e+00> : vector<16x64xf32>
    %202 = tpu.matmul %200, %201, %cst_113 {dimension_numbers = #tpu.dot_dimension_numbers<[1], [0], [0], [1], [0, 0, 1, 1], [], []>} : vector<16x64xf32>, vector<64x64xf32>, vector<16x64xf32> -> vector<16x64xf32>
    %c0_114 = arith.constant 0 : index
    %c0_115 = arith.constant 0 : index
    %203 = vector.load %arg36[%c0_114, %c0_115] : memref<1x64xf32, #tpu.memory_space<vmem>>, vector<1x64xf32>
    %204 = vector.broadcast %203 : vector<1x64xf32> to vector<16x64xf32>
    %205 = arith.addf %202, %204 : vector<16x64xf32>
    %cst_116 = arith.constant 0.000000e+00 : f32
    %206 = vector.broadcast %cst_116 : f32 to vector<16x64xf32>
    %207 = arith.maximumf %205, %206 : vector<16x64xf32>
    %c0_117 = arith.constant 0 : index
    %c0_118 = arith.constant 0 : index
    %208 = vector.load %arg39[%c0_117, %c0_118] : memref<64x32xf32, #tpu.memory_space<vmem>>, vector<64x32xf32>
    %cst_119 = arith.constant dense<0.000000e+00> : vector<16x32xf32>
    %209 = tpu.matmul %207, %208, %cst_119 {dimension_numbers = #tpu.dot_dimension_numbers<[1], [0], [0], [1], [0, 0, 1, 1], [], []>} : vector<16x64xf32>, vector<64x32xf32>, vector<16x32xf32> -> vector<16x32xf32>
    %c0_120 = arith.constant 0 : index
    %c0_121 = arith.constant 0 : index
    %210 = vector.load %arg38[%c0_120, %c0_121] : memref<1x32xf32, #tpu.memory_space<vmem>>, vector<1x32xf32>
    %211 = vector.broadcast %210 : vector<1x32xf32> to vector<16x32xf32>
    %212 = arith.addf %209, %211 : vector<16x32xf32>
    %c0_122 = arith.constant 0 : index
    %c0_123 = arith.constant 0 : index
    %213 = vector.load %arg0[%c0_122, %c0_123] : memref<4x1xi32, #tpu.memory_space<vmem>>, vector<4x1xi32>
    %c0_124 = arith.constant 0 : index
    %c0_125 = arith.constant 0 : index
    %214 = vector.load %arg1[%c0_124, %c0_125] : memref<4x1xi32, #tpu.memory_space<vmem>>, vector<4x1xi32>
    %215 = tpu.iota {dimensions = array<i32: 1>} : vector<4x16xi32>
    %216 = tpu.iota {dimensions = array<i32: 1>} : vector<4x8xi32>
    %217 = vector.broadcast %213 : vector<4x1xi32> to vector<4x16xi32>
    %218 = arith.cmpi eq, %215, %217 : vector<4x16xi32>
    %219 = arith.extui %218 : vector<4x16xi1> to vector<4x16xi32>
    %220 = arith.sitofp %219 : vector<4x16xi32> to vector<4x16xf32>
    %c8_i32 = arith.constant 8 : i32
    %221 = vector.broadcast %c8_i32 : i32 to vector<4x1xi32>
    %222 = arith.addi %214, %221 : vector<4x1xi32>
    %223 = vector.broadcast %222 : vector<4x1xi32> to vector<4x16xi32>
    %224 = arith.cmpi eq, %215, %223 : vector<4x16xi32>
    %225 = arith.extui %224 : vector<4x16xi1> to vector<4x16xi32>
    %226 = arith.sitofp %225 : vector<4x16xi32> to vector<4x16xf32>
    %227 = vector.broadcast %214 : vector<4x1xi32> to vector<4x8xi32>
    %228 = arith.cmpi eq, %216, %227 : vector<4x8xi32>
    %229 = arith.extui %228 : vector<4x8xi1> to vector<4x8xi32>
    %230 = arith.sitofp %229 : vector<4x8xi32> to vector<4x8xf32>
    %cst_126 = arith.constant dense<0.000000e+00> : vector<4x32xf32>
    %231 = tpu.matmul %220, %212, %cst_126 {dimension_numbers = #tpu.dot_dimension_numbers<[1], [0], [0], [1], [0, 0, 1, 1], [], []>} : vector<4x16xf32>, vector<16x32xf32>, vector<4x32xf32> -> vector<4x32xf32>
    %cst_127 = arith.constant dense<0.000000e+00> : vector<4x32xf32>
    %232 = tpu.matmul %226, %212, %cst_127 {dimension_numbers = #tpu.dot_dimension_numbers<[1], [0], [0], [1], [0, 0, 1, 1], [], []>} : vector<4x16xf32>, vector<16x32xf32>, vector<4x32xf32> -> vector<4x32xf32>
    %cst_128 = arith.constant dense<0.000000e+00> : vector<4x32xf32>
    %233 = tpu.matmul %230, %7, %cst_128 {dimension_numbers = #tpu.dot_dimension_numbers<[1], [0], [0], [1], [0, 0, 1, 1], [], []>} : vector<4x8xf32>, vector<8x32xf32>, vector<4x32xf32> -> vector<4x32xf32>
    %c0_129 = arith.constant 0 : index
    %c0_130 = arith.constant 0 : index
    %234 = vector.load %arg33[%c0_129, %c0_130] : memref<1x32xf32, #tpu.memory_space<vmem>>, vector<1x32xf32>
    %235 = vector.broadcast %234 : vector<1x32xf32> to vector<4x32xf32>
    %236 = arith.mulf %233, %235 : vector<4x32xf32>
    %cst_131 = arith.constant dense<0.000000e+00> : vector<4xf32>
    %237 = vector.multi_reduction <add>, %236, %cst_131 [1] : vector<4x32xf32> to vector<4xf32>
    %238 = vector.shape_cast %237 : vector<4xf32> to vector<4x1xf32>
    %c0_132 = arith.constant 0 : index
    %c0_133 = arith.constant 0 : index
    %239 = vector.load %arg32[%c0_132, %c0_133] : memref<1x32xf32, #tpu.memory_space<vmem>>, vector<1x32xf32>
    %240 = vector.broadcast %239 : vector<1x32xf32> to vector<4x32xf32>
    %241 = arith.mulf %232, %240 : vector<4x32xf32>
    %cst_134 = arith.constant dense<0.000000e+00> : vector<4xf32>
    %242 = vector.multi_reduction <add>, %241, %cst_134 [1] : vector<4x32xf32> to vector<4xf32>
    %243 = vector.shape_cast %242 : vector<4xf32> to vector<4x1xf32>
    %244 = arith.addf %238, %243 : vector<4x1xf32>
    %c0_135 = arith.constant 0 : index
    %c0_136 = arith.constant 0 : index
    %245 = vector.load %arg31[%c0_135, %c0_136] : memref<1x1xf32, #tpu.memory_space<vmem>>, vector<1x1xf32>
    %246 = vector.broadcast %245 : vector<1x1xf32> to vector<4x1xf32>
    %247 = arith.addf %244, %246 : vector<4x1xf32>
    %248 = vector.broadcast %247 : vector<4x1xf32> to vector<4x32xf32>
    %249 = arith.mulf %248, %232 : vector<4x32xf32>
    %cst_137 = arith.constant 1.000000e+00 : f32
    %250 = vector.broadcast %cst_137 : f32 to vector<4x1xf32>
    %251 = arith.subf %250, %247 : vector<4x1xf32>
    %252 = vector.broadcast %251 : vector<4x1xf32> to vector<4x32xf32>
    %253 = arith.mulf %252, %233 : vector<4x32xf32>
    %254 = arith.addf %249, %253 : vector<4x32xf32>
    %c0_138 = arith.constant 0 : index
    %c0_139 = arith.constant 0 : index
    %255 = vector.load %arg41[%c0_138, %c0_139] : memref<32x64xf32, #tpu.memory_space<vmem>>, vector<32x64xf32>
    %cst_140 = arith.constant dense<0.000000e+00> : vector<4x64xf32>
    %256 = tpu.matmul %254, %255, %cst_140 {dimension_numbers = #tpu.dot_dimension_numbers<[1], [0], [0], [1], [0, 0, 1, 1], [], []>} : vector<4x32xf32>, vector<32x64xf32>, vector<4x64xf32> -> vector<4x64xf32>
    %c0_141 = arith.constant 0 : index
    %c0_142 = arith.constant 0 : index
    %257 = vector.load %arg40[%c0_141, %c0_142] : memref<1x64xf32, #tpu.memory_space<vmem>>, vector<1x64xf32>
    %258 = vector.broadcast %257 : vector<1x64xf32> to vector<4x64xf32>
    %259 = arith.addf %256, %258 : vector<4x64xf32>
    %cst_143 = arith.constant 0.000000e+00 : f32
    %260 = vector.broadcast %cst_143 : f32 to vector<4x64xf32>
    %261 = arith.maximumf %259, %260 : vector<4x64xf32>
    %c0_144 = arith.constant 0 : index
    %c0_145 = arith.constant 0 : index
    %262 = vector.load %arg43[%c0_144, %c0_145] : memref<64x64xf32, #tpu.memory_space<vmem>>, vector<64x64xf32>
    %cst_146 = arith.constant dense<0.000000e+00> : vector<4x64xf32>
    %263 = tpu.matmul %261, %262, %cst_146 {dimension_numbers = #tpu.dot_dimension_numbers<[1], [0], [0], [1], [0, 0, 1, 1], [], []>} : vector<4x64xf32>, vector<64x64xf32>, vector<4x64xf32> -> vector<4x64xf32>
    %c0_147 = arith.constant 0 : index
    %c0_148 = arith.constant 0 : index
    %264 = vector.load %arg42[%c0_147, %c0_148] : memref<1x64xf32, #tpu.memory_space<vmem>>, vector<1x64xf32>
    %265 = vector.broadcast %264 : vector<1x64xf32> to vector<4x64xf32>
    %266 = arith.addf %263, %265 : vector<4x64xf32>
    %cst_149 = arith.constant 0.000000e+00 : f32
    %267 = vector.broadcast %cst_149 : f32 to vector<4x64xf32>
    %268 = arith.maximumf %266, %267 : vector<4x64xf32>
    %c0_150 = arith.constant 0 : index
    %c0_151 = arith.constant 0 : index
    %269 = vector.load %arg45[%c0_150, %c0_151] : memref<64x32xf32, #tpu.memory_space<vmem>>, vector<64x32xf32>
    %cst_152 = arith.constant dense<0.000000e+00> : vector<4x32xf32>
    %270 = tpu.matmul %268, %269, %cst_152 {dimension_numbers = #tpu.dot_dimension_numbers<[1], [0], [0], [1], [0, 0, 1, 1], [], []>} : vector<4x64xf32>, vector<64x32xf32>, vector<4x32xf32> -> vector<4x32xf32>
    %c0_153 = arith.constant 0 : index
    %c0_154 = arith.constant 0 : index
    %271 = vector.load %arg44[%c0_153, %c0_154] : memref<1x32xf32, #tpu.memory_space<vmem>>, vector<1x32xf32>
    %272 = vector.broadcast %271 : vector<1x32xf32> to vector<4x32xf32>
    %273 = arith.addf %270, %272 : vector<4x32xf32>
    %c0_155 = arith.constant 0 : index
    %c0_156 = arith.constant 0 : index
    %274 = vector.load %arg47[%c0_155, %c0_156] : memref<4x32xf32, #tpu.memory_space<vmem>>, vector<4x32xf32>
    tpu.vector_store %arg47[%c0_155, %c0_156], %231 {strides = array<i32>} : memref<4x32xf32, #tpu.memory_space<vmem>>, vector<4x32xf32>,
    %c0_157 = arith.constant 0 : index
    %c0_158 = arith.constant 0 : index
    %275 = vector.load %arg48[%c0_157, %c0_158] : memref<4x32xf32, #tpu.memory_space<vmem>>, vector<4x32xf32>
    tpu.vector_store %arg48[%c0_157, %c0_158], %273 {strides = array<i32>} : memref<4x32xf32, #tpu.memory_space<vmem>>, vector<4x32xf32>,
    return
  }
}

</mosaic_0001>

<bundles_post_ra>
// kernel: maignet_forward.1
= control target key start
LH: loop header
LB: loop body
LE: loop exit
PB: predicated region body
PF: predicated region fallthrough
CT: control target
= control target key end

     0   :  { %s3826_s6 = smov 1   ;;  %s3827_s10 = smov 2   ;;  %s4488_s0 = inlined_call_operand.smem [shape: u32[49], index: -1, kind: input, shape index: {}] }
   0x1   :  { %s3891_s5 = sld [smem:[%s4488_s0]]   ;;  %s3828_s14 = smov 3  }
   0x2   :  { %s3896_s9 = sld [smem:[%s4488_s0 + %s3826_s6]]   ;;  %s3829_s18 = smov 4  }
   0x3   :  { %s3901_s13 = sld [smem:[%s4488_s0 + %s3827_s10]]   ;;  %s3830_s22 = smov 5  }
   0x4   :  { %s3906_s17 = sld [smem:[%s4488_s0 + %s3828_s14]]   ;;  %s3831_s26 = smov 6  }
   0x5   :  { %s3911_s21 = sld [smem:[%s4488_s0 + %s3829_s18]]   ;;  %s3832_s30 = smov 7  }
   0x6   :  { %s3916_s25 = sld [smem:[%s4488_s0 + %s3830_s22]]   ;;  %s3833_s4 = smov 8  }
   0x7   :  { %4501 = sst [smem:[#allocation9_spill]] %s3891_s5  ;;  %s3834_s10 = smov 9  }
   0x8   :  { %4502 = sst [smem:[#allocation10_spill]] %s3896_s9  ;;  %s3835_s15 = smov 10  }
   0x9   :  { %s3921_s29 = sld [smem:[%s4488_s0 + %s3831_s26]]   ;;  %s3836_s20 = smov 11  }
   0xa   :  { %s3926_s3 = sld [smem:[%s4488_s0 + %s3832_s30]]   ;;  %s3837_s26 = smov 12  }
   0xb   :  { %s3931_s8 = sld [smem:[%s4488_s0 + %s3833_s4]]   ;;  %s3838_s1 = smov 13  }
   0xc   :  { %s3936_s14 = sld [smem:[%s4488_s0 + %s3834_s10]]   ;;  %s3839_s7 = smov 14  }
   0xd   :  { %s3941_s19 = sld [smem:[%s4488_s0 + %s3835_s15]]   ;;  %s3840_s15 = smov 15  }
   0xe   :  { %s3946_s24 = sld [smem:[%s4488_s0 + %s3836_s20]]   ;;  %s3841_s22 = smov 16  }
   0xf   :  { %s3951_s30 = sld [smem:[%s4488_s0 + %s3837_s26]]   ;;  %s3842_s28 = smov 17  }
  0x10   :  { %s3956_s6 = sld [smem:[%s4488_s0 + %s3838_s1]]   ;;  %s3857_s23 = smov 32  }
  0x11   :  { %s3961_s12 = sld [smem:[%s4488_s0 + %s3839_s7]]   ;;  %s3843_s7 = smov 18  }
  0x12   :  { %s3966_s20 = sld [smem:[%s4488_s0 + %s3840_s15]]   ;;  %s3844_s15 = smov 19  }
  0x13   :  { %s3971_s27 = sld [smem:[%s4488_s0 + %s3841_s22]]   ;;  %s3845_s22 = smov 20  }
  0x14   :  { %4503 = sst [smem:[#allocation11_spill]] %s3946_s24  ;;  %s3858_s1 = smov 33  }
  0x15   :  { %s3976_s4 = sld [smem:[%s4488_s0 + %s3842_s28]]   ;;  %s3846_s28 = smov 21  }
  0x16   :  { %s3981_s9 = sld [smem:[%s4488_s0 + %s3843_s7]]   ;;  %s3847_s7 = smov 22  }
  0x17   :  { %4504 = sst [smem:[#allocation12_spill]] %s3961_s12  ;;  %s3859_s10 = smov 34  }
  0x18   :  { %s3986_s5 = sld [smem:[%s4488_s0 + %s3844_s15]]   ;;  %s3848_s15 = smov 23  }
  0x19   :  { %s3991_s12 = sld [smem:[%s4488_s0 + %s3845_s22]]   ;;  %s3849_s22 = smov 24  }
  0x1a   :  { %s3860_s16 = smov 35  }
  0x1b   :  { %4505 = sst [smem:[#allocation13_spill]] %s3976_s4 }
  0x1c   :  { %4506 = sst [smem:[#allocation14_spill]] %s3981_s9 }
  0x1d   :  { %s3996_s4 = sld [smem:[%s4488_s0 + %s3846_s28]]   ;;  %s3850_s28 = smov 25  }
  0x1e   :  { %4507 = sst [smem:[#allocation15_spill]] %s3986_s5 }
  0x1f   :  { %4508 = sst [smem:[#allocation16_spill]] %s3991_s12 }
  0x20   :  { %s4001_s9 = sld [smem:[%s4488_s0 + %s3847_s7]]   ;;  %s3851_s7 = smov 26  }
  0x21   :  { %s4006_s5 = sld [smem:[%s4488_s0 + %s3848_s15]]   ;;  %s3852_s15 = smov 27  }
  0x22   :  { %s4011_s12 = sld [smem:[%s4488_s0 + %s3849_s22]]   ;;  %s3853_s22 = smov 28  }
  0x23   :  { %4509 = sst [smem:[#allocation17_spill]] %s3996_s4 }
  0x24   :  { %s4016_s4 = sld [smem:[%s4488_s0 + %s3850_s28]]   ;;  %s3854_s28 = smov 29  }
  0x25   :  { %s4064_s24 = sld [smem:[%s4488_s0 + %s3860_s16]]   ;;  %s3864_s16 = smov 39  }
  0x26   :  { %4510 = sst [smem:[#allocation18_spill]] %s4001_s9 }
  0x27   :  { %4511 = sst [smem:[#allocation19_spill]] %s4006_s5 }
  0x28   :  { %4512 = sst [smem:[#allocation20_spill]] %s4011_s12 }
  0x29   :  { %s4021_s9 = sld [smem:[%s4488_s0 + %s3851_s7]]   ;;  %s3855_s7 = smov 30  }
  0x2a   :  { %4513 = sst [smem:[#allocation21_spill]] %s4016_s4 }
  0x2b   :  { %s4026_s5 = sld [smem:[%s4488_s0 + %s3852_s15]]   ;;  %s3856_s15 = smov 31  }
  0x2c   :  { %s4031_s12 = sld [smem:[%s4488_s0 + %s3853_s22]]   ;;  %s3865_s22 = smov 40  }
  0x2d   :  { %s4036_s4 = sld [smem:[%s4488_s0 + %s3854_s28]]  }
  0x2f   :  { %4514 = sst [smem:[#allocation22_spill]] %s4021_s9 }
  0x30   :  { %s4041_s9 = sld [smem:[%s4488_s0 + %s3855_s7]]  }
  0x31   :  { %4515 = sst [smem:[#allocation23_spill]] %s4026_s5 }
  0x32   :  { %4516 = sst [smem:[#allocation24_spill]] %s4031_s12 }
  0x33   :  { %4517 = sst [smem:[#allocation25_spill]] %s4036_s4 }
  0x34   :  { %s2879_s5 = sld [smem:[%s4488_s0 + %s3856_s15]]  }
  0x35   :  { %s4049_s12 = sld [smem:[%s4488_s0 + %s3857_s23]]   ;;  %s3861_s23 = smov 36  }
  0x36   :  { %4518 = sst [smem:[#allocation26_spill]] %s4041_s9 }
  0x37   :  { %s4054_s4 = sld [smem:[%s4488_s0 + %s3858_s1]]   ;;  %s3862_s1 = smov 37  }
  0x38   :  { %s4059_s9 = sld [smem:[%s4488_s0 + %s3859_s10]]   ;;  %s3863_s10 = smov 38  }
  0x39   :  { %s4079_s15 = sld [smem:[%s4488_s0 + %s3863_s10]]   ;;  %s3867_s10 = smov 42  }
  0x3a   :  { %v103_v0 = vstv %s2879_s5  ;;  %s3866_s5 = smov 41  }
  0x3b   :  { %4519 = sst [smem:[#allocation27_spill]] %s4049_s12  ;;  %104 = vst [vmem:[#allocation2] sm:$0x1] %v103_v0 }
  0x3c   :  { %s4069_s12 = sld [smem:[%s4488_s0 + %s3861_s23]]  }
  0x3d   :  { %4520 = sst [smem:[#allocation28_spill]] %s4054_s4 }
  0x3e   :  { %4521 = sst [smem:[#allocation29_spill]] %s4059_s9  ;;  %s3868_s9 = smov 43  }
  0x3f   :  { %s4074_s4 = sld [smem:[%s4488_s0 + %s3862_s1]]  }
  0x40   :  { %4524 = sst [smem:[#allocation32_spill]] %s4079_s15  ;;  %s3871_s15 = smov 46  }
  0x41   :  { %s4084_s23 = sld [smem:[%s4488_s0 + %s3864_s16]]   ;;  %s3872_s16 = smov 47  }
  0x42   :  { %4522 = sst [smem:[#allocation30_spill]] %s4069_s12  ;;  %s3869_s12 = smov 44  }
  0x43   :  { %s4089_s1 = sld [smem:[%s4488_s0 + %s3865_s22]]   ;;  %s3873_s22 = smov 48  }
  0x44   :  { %s4094_s7 = sld [smem:[%s4488_s0 + %s3866_s5]]   ;;  %s3870_s5 = smov 45  }
  0x45   :  { %4523 = sst [smem:[#allocation31_spill]] %s4074_s4 }
  0x46   :  { %s4099_s4 = sld [smem:[%s4488_s0 + %s3867_s10]]  }
  0x47   :  { %4525 = sst [smem:[#allocation33_spill]] %s4084_s23 }
  0x48   :  { %s4104_s23 = sld [smem:[%s4488_s0 + %s3868_s9]]  }
  0x49   :  { %4526 = sst [smem:[#allocation34_spill]] %s4089_s1 }
  0x4a   :  { %4527 = sst [smem:[#allocation35_spill]] %s4094_s7 }
  0x4b   :  { %s4109_s1 = sld [smem:[%s4488_s0 + %s3869_s12]]  }
  0x4c   :  { %4528 = sst [smem:[#allocation36_spill]] %s4099_s4 }
  0x4d   :  { %s4114_s7 = sld [smem:[%s4488_s0 + %s3870_s5]]  }
  0x4e   :  { %4529 = sst [smem:[#allocation37_spill]] %s4104_s23 }
  0x4f   :  { %s2894_s4 = sld [smem:[%s4488_s0 + %s3871_s15]]  }
  0x50   :  { %s4122_s23 = sld [smem:[%s4488_s0 + %s3872_s16]]  }
  0x51   :  { %4530 = sst [smem:[#allocation38_spill]] %s4109_s1 }
  0x52   :  { %s4127_s1 = sld [smem:[%s4488_s0 + %s3873_s22]]  }
  0x53   :  { %105 = vsyncpa [#allocation4], 0  ;;  %v206_v1 = vld [vmem:[%s3911_s21] sm:$0xff]  ;;  %v207_v2 = vld [vmem:[%s3911_s21 + $0x8] sm:$0xff]  ;;  %v3874_v3 = vmov 0.0|0.0   ;;  %vm3875_vm0 = vmmov 0  }
  0x54   :  { %3445 = vmatprep.subr.bf16.mxu0 %v3874_v3  ;;  %v3446_v4 = vpack.c.bf16 %v207_v2, %v206_v1  ;;  %v3876_v5 = vmov 0.0  }
  0x55   :  { %3126 = vmatprep.mubr.msk.f32.mxu0 %vm3875_vm0, %v3876_v5 }
  0x56   :  { %106 = vsyncpa [#allocation6], 0  ;;  %3448 = vmatprep.subr.bf16.mxu1 %v3874_v3  ;;  %3137 = vmatprep.mubr.msk.f32.mxu1 %vm3875_vm0, %v3876_v5  ;;  %v205_v6 = vld [vmem:[%s2894_s4] sm:$0xff]  ;;  %vm215_vm1 = vcmask 130048   ;;  %vm289_vm2 = vcmask 261120   ;;  %v306_v9 = vld [vmem:[%s3926_s3 + $0x8] sm:$0xff]  ;;  %v477_v2 = vlaneseq }
  0x57   :  { %3447 = vmatpush3.bf16.msra.mxu0 %v3446_v4  ;;  %v4139_v7 = vld [vmem:[%s3936_s14] sm:$0xff]  ;;  %v386_v12 = vld [vmem:[%s3931_s8 + $0x8] sm:$0xff]  ;;  %v307_v14 = vld [vmem:[%s3926_s3 + $0x10] sm:$0xff]  ;;  %s4531_s0 = sld [smem:[#allocation11_spill]]  ;;  %s4534_s21 = sld [smem:[#allocation15_spill]]  ;;  %vm1968_vm9 = vcmask 523264  }
  0x58   :  { %v305_v8 = vld [vmem:[%s3926_s3] sm:$0xff]  ;;  %v308_v15 = vld [vmem:[%s3926_s3 + $0x18] sm:$0xff]  ;;  %v387_v17 = vld [vmem:[%s3931_s8 + $0x10] sm:$0xff]  ;;  %v297_v22 = vsel %vm289_vm2, %v4139_v7, 0.0  ;;  %s4537_s3 = sld [smem:[#allocation13_spill]]  ;;  %s4544_s4 = sld [smem:[#allocation20_spill]] }
  0x59   :  { %v3449_v10 = vpack.c.bf16 %v306_v9, %v305_v8  ;;  %v385_v11 = vld [vmem:[%s3931_s8] sm:$0xff]  ;;  %v3452_v16 = vpack.c.bf16 %v308_v15, %v307_v14  ;;  %v388_v18 = vld [vmem:[%s3931_s8 + $0x18] sm:$0xff]  ;;  %v4153_v19 = vld [vmem:[%s3936_s14 + $0x8] sm:$0xff]  ;;  %v298_v23 = vrot.slane %v297_v22, 4  ;;  %v478_v8 = vshrl.u32 %v477_v2, 7  ;;  %s4538_s8 = sld [smem:[#allocation14_spill]] }
  0x5a   :  { %3127 = vmatmul.mubr.msk.f32.vlgmr.msra.gmra.mrb[0].mxu0 %vm215_vm1, %v205_v6  ;;  %v3454_v13 = vpack.c.bf16 %v386_v12, %v385_v11  ;;  %v3458_v20 = vpack.c.bf16 %v388_v18, %v387_v17  ;;  %v3462_v21 = vpack.c.bf16 %v4153_v19, %v4139_v7  ;;  %v2897_v25 = vld [vmem:[%s3906_s17] ss:$0 sm:$0xff]  ;;  %v774_v43 = vld [vmem:[%s3951_s30 + $0x8] sm:$0xff]  ;;  %v775_v46 = vld [vmem:[%s3951_s30 + $0x10] sm:$0xff]  ;;  %s4533_s17 = sld [smem:[#allocation19_spill]]  ;;  %s4545_s5 = sld [smem:[#allocation21_spill]] }
  0x5b   :  { %3148 = vmatprep.mubr.msk.f32.mxu0 %vm289_vm2, %v4139_v7  ;;  %3450 = vmatpush3.bf16.msra.mxu1 %v3449_v10  ;;  %v299_v24 = vadd.f32 %v298_v23, %v297_v22  ;;  %v4170_v41 = vld [vmem:[%s3901_s13] sm:$0xff]  ;;  %v4178_v44 = vld [vmem:[%s3901_s13 + $0x8] sm:$0xff]  ;;  %v776_v47 = vld [vmem:[%s3951_s30 + $0x18] sm:$0xff]  ;;  %v4206_v12 = vsub.s32 0, %v478_v8  ;;  %s4532_s13 = sld [smem:[#allocation12_spill]]  ;;  %s4546_s28 = sld [smem:[#allocation24_spill]] }
  0x5c   :  { %3451 = vmatprep.subr.bf16.mxu1 %v3874_v3  ;;  %3455 = vmatprep.subr.bf16.mxu0 %v3454_v13  ;;  %v773_v42 = vld [vmem:[%s3951_s30] sm:$0xff]  ;;  %v851_v49 = vld [vmem:[%s3956_s6 + $0x8] sm:$0xff]  ;;  %v3486_v50 = vpack.c.bf16 %v776_v47, %v775_v46  ;;  %v852_v52 = vld [vmem:[%s3956_s6 + $0x10] sm:$0xff]  ;;  %s4540_s30 = sld [smem:[#allocation26_spill]]  ;;  %s3877_s2 = smov 64   ;;  %vm1971_vm10 = vcmask 785408  }
  0x5d   :  { %3457 = vmatpush3.bf16.msra.mxu0 %v3454_v13  ;;  %v300_v27 = vrot.slane %v299_v24, 2  ;;  %v3483_v45 = vpack.c.bf16 %v774_v43, %v773_v42  ;;  %v850_v48 = vld [vmem:[%s3956_s6] sm:$0xff]  ;;  %v853_v53 = vld [vmem:[%s3956_s6 + $0x18] sm:$0xff]  ;;  %v579_v56 = vld [vmem:[%s3971_s27 + $0x8] sm:$0xff]  ;;  %s4541_s6 = sld [smem:[#allocation22_spill]]  ;;  %s3878_s15 = smov 32  }
  0x5e   :  { %3459 = vmatprep.subr.bf16.mxu0 %v3458_v20  ;;  %v3488_v51 = vpack.c.bf16 %v851_v49, %v850_v48  ;;  %v3492_v54 = vpack.c.bf16 %v853_v53, %v852_v52  ;;  %v578_v55 = vld [vmem:[%s3971_s27] sm:$0xff]  ;;  %v580_v58 = vld [vmem:[%s3971_s27 + $0x10] sm:$0xff]  ;;  %v581_v59 = vld [vmem:[%s3971_s27 + $0x18] sm:$0xff]  ;;  %s4543_s27 = sld [smem:[#allocation25_spill]]  ;;  %s4547_s10 = sld [smem:[#allocation31_spill]]  ;;  %vm2437_vm14 = vcmask 64512  }
  0x5f   :  { %3453 = vmatpush3.bf16.msra.mxu1 %v3452_v16  ;;  %v301_v32 = vadd.f32 %v300_v27, %v299_v24  ;;  %v3466_v57 = vpack.c.bf16 %v579_v56, %v578_v55  ;;  %v3470_v61 = vpack.c.bf16 %v581_v59, %v580_v58  ;;  %v572_v63 = vld [vmem:[%s3966_s20] sm:$0xff]  ;;  %v573_v0 = vld [vmem:[%s3966_s20 + $0x8] sm:$0xff]  ;;  %v574_v18 = vld [vmem:[%s3966_s20 + $0x10] sm:$0xff]  ;;  %s4548_s11 = sld [smem:[#allocation33_spill]]  ;;  %s4551_s9 = sld [smem:[#allocation10_spill]]  ;;  %vm2519_vm15 = vcmask 257024  }
  0x60   :  { %3463 = vmatprep.subr.bf16.mxu1 %v3462_v21  ;;  %v3474_v1 = vpack.c.bf16 %v573_v0, %v572_v63  ;;  %v309_v4 = vld [vmem:[%s3916_s25] sm:$0x1]  ;;  %s4535_s25 = sld [smem:[#allocation16_spill]]  ;;  %s4550_s16 = sld [smem:[#allocation9_spill]] }
  0x61   :  { %3461 = vmatpush3.bf16.msra.mxu0 %v3458_v20  ;;  %v302_v35 = vrot.slane %v301_v32, 1  ;;  %v310_v6 = vmul.f32 16.0, %v309_v4  ;;  %v2900_v10 = vld [vmem:[%s3921_s29] ss:$0 sm:$0xff]  ;;  %v575_v20 = vld [vmem:[%s3966_s20 + $0x18] sm:$0xff]  ;;  %s4536_s29 = sld [smem:[#allocation18_spill]] }
  0x62   :  { %3467 = vmatprep.subr.bf16.mxu0 %v3466_v57  ;;  %v777_v24 = vld [vmem:[%s3941_s19] sm:$0x1]  ;;  %s4539_s19 = sld [smem:[#allocation17_spill]]  ;;  %s4542_s20 = sld [smem:[#allocation23_spill]] }
  0x63   :  { %v303_v38 = vadd.f32 %v302_v35, %v301_v32  ;;  %v2909_v47 = vld [vmem:[%s4532_s13] ss:$0 sm:$0xff]  ;;  %s4552_s18 = sld [smem:[#allocation30_spill]]  ;;  %s4553_s22 = sld [smem:[#allocation32_spill]] }
  0x64   :  { %3149 = vmatmul.mubr.msk.f32.vlgmr.msra.gmra.mrb[2].mxu0 %vm289_vm2, %v4153_v19  ;;  %s4554_s12 = sld [smem:[#allocation27_spill]]  ;;  %s4555_s26 = sld [smem:[#allocation28_spill]] }
  0x65   :  { %3469 = vmatpush3.bf16.msra.mxu0 %v3466_v57  ;;  %s4557_s13 = sld [smem:[#allocation37_spill]] }
  0x66   :  { %3471 = vmatprep.subr.bf16.mxu0 %v3470_v61 }
  0x69   :  { %3473 = vmatpush3.bf16.msra.mxu0 %v3470_v61  ;;  %v1031_v61 = vld [vmem:[%s4533_s17] sm:$0xff] }
  0x6a   :  { %3475 = vmatprep.subr.bf16.mxu0 %v3474_v1 }
 0x12d   :  { %v285_v26 = vpop.f32.mrb[0].mxu0 }
 0x12e   :  { %v4162_v28 = vadd.f32 %v2897_v25, %v285_v26  ;;  %v3128_v29 = vpop.f32.mrb[1].mxu0  ;;  %v3478_v26 = vpack.c.bf16 %v575_v20, %v574_v18  ;;  %v1235_v18 = vld [vmem:[%s4534_s21 + $0x8] sm:$0xff] }
 0x130   :  { %v290_v30 = vsel %vm289_vm2, %v4162_v28, 0.0 }
 0x131   :  { %v291_v31 = vrot.slane %v290_v30, 4 }
 0x133   :  { %v292_v33 = vadd.f32 %v291_v31, %v290_v30  ;;  %v778_v31 = vmul.f32 16.0, %v777_v24  ;;  %v1237_v24 = vld [vmem:[%s4534_s21 + $0x18] sm:$0xff] }
 0x135   :  { %v293_v34 = vrot.slane %v292_v33, 2 }
 0x137   :  { %v294_v36 = vadd.f32 %v293_v34, %v292_v33  ;;  %v3150_v60 = vpop.f32.mrb[2].mxu0 }
 0x138   :  { %v468_v62 = vpop.f32.mrb[3].mxu0  ;;  %v474_v15 = vadd.f32 %v3150_v60, %v2900_v10 }
 0x139   :  { %v295_v37 = vrot.slane %v294_v36, 1  ;;  %v469_v16 = vadd.f32 %v2900_v10, %v468_v62  ;;  %v1032_v62 = vld [vmem:[%s4533_s17 + $0x8] sm:$0xff] }
 0x13a   :  { %v3500_v63 = vpack.c.bf16 %v1032_v62, %v1031_v61 }
 0x13b   :  { %v4166_v39 = vadd.f32 %v295_v37, %v294_v36 }
 0x13d   :  { %v304_v40 = vadd.f32 %v303_v38, %v4166_v39 }
 0x13f   :  { %3138 = vmatmul.mubr.msk.f32.vlgmr.msra.gmra.mrb[0].mxu1 %vm289_vm2, %v304_v40 }
 0x140   :  { %3465 = vmatpush3.bf16.msra.mxu1 %v3462_v21  ;;  %3155 = vmatprep.mubr.msk.f32.mxu1 %vm215_vm1, %v4170_v41 }
 0x141   :  { %3482 = vmatprep.subr.bf16.mxu1 %v3874_v3 }
 0x143   :  { %3156 = vmatmul.mubr.msk.f32.vlgmr.msra.gmra.mrb[2].mxu1 %vm215_vm1, %v4178_v44 }
 0x144   :  { %3484 = vmatpush3.bf16.msra.mxu1 %v3483_v45  ;;  %3188 = vmatprep.mubr.msk.f32.mxu1 %vm3875_vm0, %v3876_v5 }
 0x145   :  { %3485 = vmatprep.subr.bf16.mxu1 %v3874_v3 }
 0x148   :  { %3487 = vmatpush3.bf16.msra.mxu1 %v3486_v50 }
 0x149   :  { %3489 = vmatprep.subr.bf16.mxu1 %v3488_v51 }
 0x14b   :  { %3189 = vmatmul.mubr.msk.f32.vlgmr.msra.gmra.mrb[4].mxu1 %vm289_vm2, %v304_v40 }
 0x14c   :  { %3491 = vmatpush3.bf16.msra.mxu1 %v3488_v51  ;;  %3199 = vmatprep.mubr.msk.f32.mxu1 %vm289_vm2, %v4139_v7 }
 0x14d   :  { %3493 = vmatprep.subr.bf16.mxu1 %v3492_v54 }
 0x150   :  { %3495 = vmatpush3.bf16.msra.mxu1 %v3492_v54 }
 0x151   :  { %3501 = vmatprep.subr.bf16.mxu1 %v3500_v63 }
 0x153   :  { %3200 = vmatmul.mubr.msk.f32.vlgmr.msra.gmra.mrb[6].mxu1 %vm289_vm2, %v4153_v19 }
 0x154   :  { %3503 = vmatpush3.bf16.msra.mxu1 %v3500_v63 }
 0x212   :  { %v380_v9 = vpop.f32.mrb[0].mxu1 }
 0x213   :  { %v381_v11 = vadd.f32 %v380_v9, %v310_v6  ;;  %v3139_v13 = vpop.f32.mrb[1].mxu1 }
 0x215   :  { %v384_v14 = vmul.f32 0.17677669, %v381_v11 }
 0x216   :  { %v3157_v17 = vpop.f32.mrb[2].mxu1 }
 0x217   :  { %v480_v21 = vrot.slane %v384_v14, %v4206_v12  ;;  %v561_v22 = vpop.f32.mrb[3].mxu1  ;;  %v577_v25 = vmul.f32 %v3157_v17, %v4153_v19  ;;  %v571_v35 = vadd.f32 %v3157_v17, %v4153_v19  ;;  %v1234_v17 = vld [vmem:[%s4534_s21] sm:$0xff] }
 0x218   :  { %v576_v23 = vmul.f32 %v561_v22, %v4139_v7  ;;  %v570_v30 = vadd.f32 %v561_v22, %v4139_v7  ;;  %v2911_v7 = vld [vmem:[%s4531_s0] ss:$0 sm:$0xff]  ;;  %s4556_s0 = sld [smem:[#allocation35_spill]] }
 0x219   :  { %v481_v27 = vmul.f32 %v480_v21, %v469_v16  ;;  %v482_v29 = vmul.f32 %v480_v21, %v474_v15  ;;  %v3517_v21 = vpack.c.bf16 %v1235_v18, %v1234_v17 }
 0x21a   :  { %3166 = vmatprep.mubr.msk.f32.mxu0 %vm289_vm2, %v576_v23  ;;  %v1236_v23 = vld [vmem:[%s4534_s21 + $0x10] sm:$0xff]  ;;  %s4559_s21 = sld [smem:[#allocation36_spill]] }
 0x21b   :  { %3167 = vmatmul.mubr.msk.f32.vlgmr.msra.gmra.mrb[4].mxu0 %vm289_vm2, %v577_v25  ;;  %v483_v59 = vsel %vm289_vm2, %v481_v27, 0.0  ;;  %v486_v60 = vsel %vm289_vm2, %v482_v29, 0.0  ;;  %v1315_v27 = vld [vmem:[%s4535_s25 + $0x8] sm:$0xff]  ;;  %v3520_v29 = vpack.c.bf16 %v1237_v24, %v1236_v23 }
 0x21c   :  { %3477 = vmatpush3.bf16.msra.mxu0 %v3474_v1  ;;  %3177 = vmatprep.mubr.msk.f32.mxu0 %vm289_vm2, %v570_v30 }
 0x21d   :  { %3479 = vmatprep.subr.bf16.mxu0 %v3478_v26 }
 0x21e   :  { %v845_v32 = vpop.f32.mrb[4].mxu1 }
 0x21f   :  { %v846_v33 = vadd.f32 %v845_v32, %v778_v31  ;;  %v3190_v34 = vpop.f32.mrb[5].mxu1  ;;  %v1316_v32 = vld [vmem:[%s4535_s25 + $0x10] sm:$0xff] }
 0x220   :  { %3481 = vmatpush3.bf16.msra.mxu0 %v3478_v26  ;;  %v1314_v26 = vld [vmem:[%s4535_s25] sm:$0xff] }
 0x221   :  { %v849_v36 = vmul.f32 0.17677669, %v846_v33  ;;  %v3522_v31 = vpack.c.bf16 %v1315_v27, %v1314_v26  ;;  %v1317_v33 = vld [vmem:[%s4535_s25 + $0x18] sm:$0xff]  ;;  %s3881_s25 = smov [#allocation3]  }
 0x223   :  { %3178 = vmatmul.mubr.msk.f32.vlgmr.msra.gmra.mrb[4].mxu0 %vm289_vm2, %v571_v35  ;;  %v939_v38 = vrot.slane %v849_v36, %v4206_v12  ;;  %v3526_v35 = vpack.c.bf16 %v1317_v33, %v1316_v32  ;;  %v1033_v36 = vld [vmem:[%s4533_s17 + $0x10] sm:$0xff] }
 0x224   :  { %3206 = vmatprep.mubr.msk.f32.mxu0 %vm215_vm1, %v4170_v41 }
 0x226   :  { %v3201_v37 = vpop.f32.mrb[6].mxu1 }
 0x227   :  { %v933_v40 = vadd.f32 %v3201_v37, %v2911_v7  ;;  %v927_v42 = vpop.f32.mrb[7].mxu1 }
 0x228   :  { %v928_v43 = vadd.f32 %v2911_v7, %v927_v42  ;;  %v1034_v7 = vld [vmem:[%s4533_s17 + $0x18] sm:$0xff]  ;;  %s4558_s17 = sld [smem:[#allocation34_spill]] }
 0x229   :  { %v4224_v45 = vmul.f32 %v939_v38, %v933_v40  ;;  %v3504_v37 = vpack.c.bf16 %v1034_v7, %v1033_v36  ;;  %v1026_v40 = vld [vmem:[%s4536_s29 + $0x8] sm:$0xff] }
 0x22a   :  { %v4226_v46 = vmul.f32 %v939_v38, %v928_v43  ;;  %v1025_v38 = vld [vmem:[%s4536_s29] sm:$0xff] }
 0x22b   :  { %3505 = vmatprep.subr.bf16.mxu1 %v3504_v37  ;;  %v3508_v42 = vpack.c.bf16 %v1026_v40, %v1025_v38  ;;  %v945_v26 = vsel %vm289_vm2, %v4224_v45, 0.0 }
 0x22c   :  { %3507 = vmatpush3.bf16.msra.mxu1 %v3504_v37 }
 0x22d   :  { %3509 = vmatprep.subr.bf16.mxu1 %v3508_v42 }
 0x2f6   :  { %v3179_v48 = vpop.f32.mrb[4].mxu0 }
 0x2f7   :  { %v752_v19 = vadd.f32 %v3179_v48, %v2909_v47  ;;  %v735_v49 = vpop.f32.mrb[5].mxu0  ;;  %v1028_v48 = vld [vmem:[%s4536_s29 + $0x18] sm:$0xff] }
 0x2f8   :  { %v751_v50 = vadd.f32 %v2909_v47, %v735_v49  ;;  %v1027_v47 = vld [vmem:[%s4536_s29 + $0x10] sm:$0xff]  ;;  %s2827_s29 = sshll.u32 %s3881_s25, 4  ;;  %s2828_s29 = int_to_ptr.vmem [resolvable:$true] %s2827_s29 }
 0x2f9   :  { %vm754_vm3 = vcmp.ge.f32.partialorder %v752_v19, 0.0  ;;  %v756_v51 = vmul.f32 0.01, %v752_v19  ;;  %p3783_p1 = scmp.lt.s32.totalorder %s2828_s29, %s2828_s29 }
 0x2fa   :  { %v755_v52 = vmul.f32 0.01, %v751_v50  ;;  %vm753_vm4 = vcmp.ge.f32.partialorder %v751_v50, 0.0 }
 0x2fb   :  { %v758_v54 = vsel %vm754_vm3, %v752_v19, %v756_v51 }
 0x2fc   :  { %v757_v53 = vsel %vm753_vm4, %v751_v50, %v755_v52  ;;  %v760_v57 = vmul.f32 %v758_v54, %v758_v54  ;;  %v1238_v50 = vld [vmem:[%s4537_s3] sm:$0x1]  ;;  %v3512_v52 = vpack.c.bf16 %v1028_v48, %v1027_v47  ;;  %v1705_v47 = vld [vmem:[%s4541_s6 + $0x8] sm:$0xff]  ;;  %s3778_s3 = scalar_lea.vmem %s2828_s29, 64 }
 0x2fd   :  { %v759_v55 = vmul.f32 %v757_v53, %v757_v53  ;;  %p3779_p0 = scmp.ne.s32.totalorder %s2828_s29, %s3778_s3  ;;  %p3784_p2 = scmp.lt.s32.totalorder %s3778_s3, %s3778_s3 }
 0x2fe   :  { %v764_v58 = vsel %vm289_vm2, %v760_v57, 0.0 }
 0x2ff   :  { %v761_v56 = vsel %vm289_vm2, %v759_v55, 0.0  ;;  %p3785_p3 = por %p3784_p2, %p3783_p1 }
 0x300   :  { %762 = vadd.xlane.f32.xlu0 %v761_v56 }
 0x301   :  { %p3786_p4 = pnand %p3785_p3, %p3779_p0 }
 0x304   :  { %765 = vadd.xlane.f32.xlu0 %v764_v58 }
 0x308   :  { %484 = vadd.xlane.f32.xlu0 %v483_v59 }
 0x30c   :  { %487 = vadd.xlane.f32.xlu0 %v486_v60  ;;  %v2922_v60 = vld [vmem:[%s4538_s8] ss:$0 sm:$0xff] }
 0x38d   :  { %v763_v0 = vpop.xlane.xlu0 %762 }
 0x38e   :  { %v767_v1 = vmax.f32 %v763_v0, 1e-24 }
 0x390   :  { %3744 = vrsqrt.f32 %v767_v1 }
 0x391   :  { %v766_v4 = vpop.xlane.xlu0 %765 }
 0x392   :  { %v768_v6 = vmax.f32 %v766_v4, 1e-24 }
 0x394   :  { %3746 = vrsqrt.f32 %v768_v6 }
 0x39a   :  { %v3745_v8 = vpop.eup %3744 }
 0x39b   :  { %v4235_v9 = vmul.f32 %v3745_v8, %v757_v53 }
 0x39d   :  { %v1226_v10 = vsel %vm289_vm2, %v4235_v9, 0.0 }
 0x39e   :  { %v3747_v11 = vpop.eup %3746  ;;  %v1227_v13 = vrot.slane %v1226_v10, 4 }
 0x39f   :  { %v4239_v14 = vmul.f32 %v3747_v11, %v758_v54  ;;  %v1239_v54 = vmul.f32 16.0, %v1238_v50  ;;  %v1706_v50 = vld [vmem:[%s4541_s6 + $0x10] sm:$0xff] }
 0x3a0   :  { %v1228_v15 = vadd.f32 %v1227_v13, %v1226_v10  ;;  %v2920_v10 = vld [vmem:[%s4539_s19] ss:$0 sm:$0xff] }
 0x3a1   :  { %v3496_v16 = vpack.c.bf16 %v4239_v14, %v4235_v9 }
 0x3a2   :  { %v1229_v20 = vrot.slane %v1228_v15, 2 }
 0x3a3   :  { %3497 = vmatprep.subr.bf16.mxu0 %v3496_v16 }
 0x3a4   :  { %3499 = vmatpush3.bf16.msra.mxu0 %v3496_v16  ;;  %v1230_v22 = vadd.f32 %v1229_v20, %v1228_v15 }
 0x3a5   :  { %3516 = vmatprep.subr.bf16.mxu0 %v3874_v3 }
 0x3a6   :  { %v1231_v25 = vrot.slane %v1230_v22, 1 }
 0x3a7   :  { %3207 = vmatmul.mubr.msk.f32.vlgmr.msra.gmra.mrb[6].mxu0 %vm215_vm1, %v4178_v44 }
 0x3a8   :  { %3518 = vmatpush3.bf16.msra.mxu0 %v3517_v21  ;;  %3239 = vmatprep.mubr.msk.f32.mxu0 %vm3875_vm0, %v3876_v5  ;;  %v1232_v30 = vadd.f32 %v1231_v25, %v1230_v22  ;;  %v942_v25 = vsel %vm289_vm2, %v4226_v46, 0.0 }
 0x3a9   :  { %3519 = vmatprep.subr.bf16.mxu0 %v3874_v3 }
 0x3aa   :  { %v1233_v34 = vadd.f32 %v1232_v30, %v4166_v39  ;;  %v1502_v30 = vld [vmem:[%s4540_s30 + $0x8] sm:$0xff] }
 0x3ac   :  { %3521 = vmatpush3.bf16.msra.mxu0 %v3520_v29  ;;  %v1501_v29 = vld [vmem:[%s4540_s30] sm:$0xff] }
 0x3ad   :  { %3523 = vmatprep.subr.bf16.mxu0 %v3522_v31 }
 0x3af   :  { %3240 = vmatmul.mubr.msk.f32.vlgmr.msra.gmra.mrb[8].mxu0 %vm289_vm2, %v1233_v34 }
 0x3b0   :  { %3525 = vmatpush3.bf16.msra.mxu0 %v3522_v31  ;;  %3250 = vmatprep.mubr.msk.f32.mxu0 %vm289_vm2, %v4235_v9  ;;  %v3534_v31 = vpack.c.bf16 %v1502_v30, %v1501_v29 }
 0x3b1   :  { %3527 = vmatprep.subr.bf16.mxu0 %v3526_v35 }
 0x3b4   :  { %3529 = vmatpush3.bf16.msra.mxu0 %v3526_v35 }
 0x3b5   :  { %3535 = vmatprep.subr.bf16.mxu0 %v3534_v31 }
 0x3b7   :  { %3251 = vmatmul.mubr.msk.f32.vlgmr.msra.gmra.mrb[10].mxu0 %vm289_vm2, %v4239_v14 }
 0x3b8   :  { %3537 = vmatpush3.bf16.msra.mxu0 %v3534_v31 }
 0x47a   :  { %v3208_v43 = vpop.f32.mrb[6].mxu0 }
 0x47b   :  { %v1014_v19 = vpop.f32.mrb[7].mxu0  ;;  %v1030_v51 = vmul.f32 %v3208_v43, %v4239_v14  ;;  %v1024_v58 = vadd.f32 %v3208_v43, %v4239_v14  ;;  %v1704_v43 = vld [vmem:[%s4541_s6] sm:$0xff] }
 0x47c   :  { %v1029_v49 = vmul.f32 %v1014_v19, %v4235_v9  ;;  %v1023_v53 = vadd.f32 %v1014_v19, %v4235_v9  ;;  %v3551_v19 = vpack.c.bf16 %v1705_v47, %v1704_v43 }
 0x47e   :  { %3217 = vmatprep.mubr.msk.f32.mxu1 %vm289_vm2, %v1029_v49 }
 0x47f   :  { %3218 = vmatmul.mubr.msk.f32.vlgmr.msra.gmra.mrb[8].mxu1 %vm289_vm2, %v1030_v51  ;;  %v1707_v51 = vld [vmem:[%s4541_s6 + $0x18] sm:$0xff] }
 0x480   :  { %3511 = vmatpush3.bf16.msra.mxu1 %v3508_v42  ;;  %3228 = vmatprep.mubr.msk.f32.mxu1 %vm289_vm2, %v1023_v53  ;;  %v1784_v53 = vld [vmem:[%s4542_s20] sm:$0xff] }
 0x481   :  { %3513 = vmatprep.subr.bf16.mxu1 %v3512_v52 }
 0x482   :  { %v1309_v55 = vpop.f32.mrb[8].mxu0 }
 0x483   :  { %v1310_v56 = vadd.f32 %v1309_v55, %v1239_v54  ;;  %v3241_v57 = vpop.f32.mrb[9].mxu0  ;;  %v1785_v54 = vld [vmem:[%s4542_s20 + $0x8] sm:$0xff]  ;;  %v3554_v55 = vpack.c.bf16 %v1707_v51, %v1706_v50 }
 0x484   :  { %3515 = vmatpush3.bf16.msra.mxu1 %v3512_v52  ;;  %v3556_v57 = vpack.c.bf16 %v1785_v54, %v1784_v53 }
 0x485   :  { %v1313_v59 = vmul.f32 0.17677669, %v1310_v56 }
 0x487   :  { %3229 = vmatmul.mubr.msk.f32.vlgmr.msra.gmra.mrb[8].mxu1 %vm289_vm2, %v1024_v58  ;;  %v1409_v62 = vrot.slane %v1313_v59, %v4206_v12  ;;  %v1786_v58 = vld [vmem:[%s4542_s20 + $0x10] sm:$0xff]  ;;  %v1787_v59 = vld [vmem:[%s4542_s20 + $0x18] sm:$0xff] }
 0x488   :  { %3257 = vmatprep.mubr.msk.f32.mxu1 %vm215_vm1, %v4170_v41 }
 0x48a   :  { %v3252_v61 = vpop.f32.mrb[10].mxu0 }
 0x48b   :  { %v1403_v63 = vadd.f32 %v3252_v61, %v2922_v60  ;;  %v1397_v0 = vpop.f32.mrb[11].mxu0  ;;  %v1503_v61 = vld [vmem:[%s4540_s30 + $0x10] sm:$0xff] }
 0x48c   :  { %v1398_v1 = vadd.f32 %v2922_v60, %v1397_v0  ;;  %v1496_v0 = vld [vmem:[%s4543_s27 + $0x8] sm:$0xff] }
 0x48d   :  { %v1411_v4 = vmul.f32 %v1409_v62, %v1403_v63 }
 0x48e   :  { %v1410_v6 = vmul.f32 %v1409_v62, %v1398_v1  ;;  %v1504_v62 = vld [vmem:[%s4540_s30 + $0x18] sm:$0xff] }
 0x48f   :  { %v1415_v27 = vsel %vm289_vm2, %v1411_v4, 0.0  ;;  %v3538_v63 = vpack.c.bf16 %v1504_v62, %v1503_v61 }
 0x490   :  { %v1412_v8 = vsel %vm289_vm2, %v1410_v6, 0.0  ;;  %v1497_v6 = vld [vmem:[%s4543_s27 + $0x10] sm:$0xff] }
 0x491   :  { %1413 = vadd.xlane.f32.xlu0 %v1412_v8  ;;  %3539 = vmatprep.subr.bf16.mxu0 %v3538_v63  ;;  %v1498_v8 = vld [vmem:[%s4543_s27 + $0x18] sm:$0xff] }
 0x492   :  { %3541 = vmatpush3.bf16.msra.mxu0 %v3538_v63 }
 0x55a   :  { %v3230_v11 = vpop.f32.mrb[8].mxu1 }
 0x55b   :  { %v1205_v13 = vadd.f32 %v3230_v11, %v2920_v10  ;;  %v1188_v15 = vpop.f32.mrb[9].mxu1 }
 0x55c   :  { %v1204_v16 = vadd.f32 %v2920_v10, %v1188_v15 }
 0x55d   :  { %vm1207_vm5 = vcmp.ge.f32.partialorder %v1205_v13, 0.0  ;;  %v1209_v17 = vmul.f32 0.01, %v1205_v13 }
 0x55e   :  { %v1208_v18 = vmul.f32 0.01, %v1204_v16  ;;  %vm1206_vm6 = vcmp.ge.f32.partialorder %v1204_v16, 0.0 }
 0x55f   :  { %v1211_v20 = vsel %vm1207_vm5, %v1205_v13, %v1209_v17  ;;  %v1708_v13 = vld [vmem:[%s4544_s4] sm:$0x1] }
 0x560   :  { %v1210_v41 = vsel %vm1206_vm6, %v1204_v16, %v1208_v18  ;;  %v1213_v23 = vmul.f32 %v1211_v20, %v1211_v20  ;;  %v3546_v16 = vpack.c.bf16 %v1498_v8, %v1497_v6  ;;  %v1709_v18 = vmul.f32 16.0, %v1708_v13 }
 0x561   :  { %v1212_v21 = vmul.f32 %v1210_v41, %v1210_v41 }
 0x562   :  { %v1217_v24 = vsel %vm289_vm2, %v1213_v23, 0.0 }
 0x563   :  { %v1214_v22 = vsel %vm289_vm2, %v1212_v21, 0.0 }
 0x564   :  { %1215 = vadd.xlane.f32.xlu1 %v1214_v22 }
 0x568   :  { %1218 = vadd.xlane.f32.xlu1 %v1217_v24  ;;  %v2933_v24 = vld [vmem:[%s4545_s5] ss:$0 sm:$0xff] }
 0x56c   :  { %943 = vadd.xlane.f32.xlu1 %v942_v25 }
 0x570   :  { %946 = vadd.xlane.f32.xlu1 %v945_v26 }
 0x574   :  { %1416 = vadd.xlane.f32.xlu1 %v1415_v27 }
 0x5f1   :  { %v1216_v32 = vpop.xlane.xlu1 %1215 }
 0x5f2   :  { %v1220_v33 = vmax.f32 %v1216_v32, 1e-24 }
 0x5f4   :  { %3748 = vrsqrt.f32 %v1220_v33 }
 0x5f5   :  { %v1219_v34 = vpop.xlane.xlu1 %1218 }
 0x5f6   :  { %v1221_v46 = vmax.f32 %v1219_v34, 1e-24 }
 0x5f8   :  { %3750 = vrsqrt.f32 %v1221_v46 }
 0x5f9   :  { %v944_v46 = vpop.xlane.xlu1 %943 }
 0x5fe   :  { %v3749_v35 = vpop.eup %3748 }
 0x5ff   :  { %v4293_v45 = vmul.f32 %v3749_v35, %v1210_v41  ;;  %v485_v35 = vpop.xlane.xlu0 %484 }
 0x601   :  { %v1696_v36 = vsel %vm289_vm2, %v4293_v45, 0.0 }
 0x602   :  { %v3751_v7 = vpop.eup %3750  ;;  %v1697_v37 = vrot.slane %v1696_v36, 4 }
 0x603   :  { %v4297_v38 = vmul.f32 %v3751_v7, %v1211_v20  ;;  %v488_v7 = vpop.xlane.xlu0 %487 }
 0x604   :  { %v1698_v40 = vadd.f32 %v1697_v37, %v1696_v36  ;;  %v947_v36 = vpop.xlane.xlu1 %946  ;;  %v1888_v37 = vmax.f32 %v485_v35, %v944_v46 }
 0x605   :  { %v3530_v42 = vpack.c.bf16 %v4297_v38, %v4293_v45  ;;  %v1889_v43 = vmax.f32 %v488_v7, %v947_v36 }
 0x606   :  { %v1699_v48 = vrot.slane %v1698_v40, 2 }
 0x607   :  { %3531 = vmatprep.subr.bf16.mxu1 %v3530_v42 }
 0x608   :  { %3533 = vmatpush3.bf16.msra.mxu1 %v3530_v42  ;;  %v1700_v49 = vadd.f32 %v1699_v48, %v1698_v40  ;;  %v1417_v40 = vpop.xlane.xlu1 %1416  ;;  %v1414_v42 = vpop.xlane.xlu0 %1413 }
 0x609   :  { %3550 = vmatprep.subr.bf16.mxu1 %v3874_v3  ;;  %v1890_v48 = vmax.f32 %v1888_v37, %v1414_v42 }
 0x60a   :  { %v1701_v52 = vrot.slane %v1700_v49, 1 }
 0x60b   :  { %3258 = vmatmul.mubr.msk.f32.vlgmr.msra.gmra.mrb[10].mxu1 %vm215_vm1, %v4178_v44  ;;  %v3560_v44 = vpack.c.bf16 %v1787_v59, %v1786_v58 }
 0x60c   :  { %3552 = vmatpush3.bf16.msra.mxu1 %v3551_v19  ;;  %3290 = vmatprep.mubr.msk.f32.mxu1 %vm3875_vm0, %v3876_v5  ;;  %v1702_v56 = vadd.f32 %v1701_v52, %v1700_v49 }
 0x60d   :  { %3553 = vmatprep.subr.bf16.mxu1 %v3874_v3 }
 0x60e   :  { %v1703_v60 = vadd.f32 %v1702_v56, %v4166_v39  ;;  %v1495_v39 = vld [vmem:[%s4543_s27] sm:$0xff] }
 0x60f   :  { %v3542_v1 = vpack.c.bf16 %v1496_v0, %v1495_v39 }
 0x610   :  { %3555 = vmatpush3.bf16.msra.mxu1 %v3554_v55 }
 0x611   :  { %3557 = vmatprep.subr.bf16.mxu1 %v3556_v57  ;;  %3543 = vmatprep.subr.bf16.mxu0 %v3542_v1 }
 0x613   :  { %3291 = vmatmul.mubr.msk.f32.vlgmr.msra.gmra.mrb[12].mxu1 %vm289_vm2, %v1703_v60 }
 0x614   :  { %3559 = vmatpush3.bf16.msra.mxu1 %v3556_v57  ;;  %3301 = vmatprep.mubr.msk.f32.mxu1 %vm289_vm2, %v4293_v45 }
 0x615   :  { %3561 = vmatprep.subr.bf16.mxu1 %v3560_v44 }
 0x618   :  { %3563 = vmatpush3.bf16.msra.mxu1 %v3560_v44 }
 0x61b   :  { %3302 = vmatmul.mubr.msk.f32.vlgmr.msra.gmra.mrb[14].mxu1 %vm289_vm2, %v4297_v38 }
 0x6de   :  { %v3259_v4 = vpop.f32.mrb[10].mxu1 }
 0x6df   :  { %v1484_v10 = vpop.f32.mrb[11].mxu1  ;;  %v1500_v15 = vmul.f32 %v3259_v4, %v4297_v38  ;;  %v1494_v22 = vadd.f32 %v3259_v4, %v4297_v38 }
 0x6e0   :  { %v1499_v11 = vmul.f32 %v1484_v10, %v4293_v45  ;;  %v1493_v17 = vadd.f32 %v1484_v10, %v4293_v45 }
 0x6e2   :  { %3268 = vmatprep.mubr.msk.f32.mxu0 %vm289_vm2, %v1499_v11 }
 0x6e3   :  { %3269 = vmatmul.mubr.msk.f32.vlgmr.msra.gmra.mrb[12].mxu0 %vm289_vm2, %v1500_v15 }
 0x6e4   :  { %3545 = vmatpush3.bf16.msra.mxu0 %v3542_v1  ;;  %3279 = vmatprep.mubr.msk.f32.mxu0 %vm289_vm2, %v1493_v17 }
 0x6e5   :  { %3547 = vmatprep.subr.bf16.mxu0 %v3546_v16 }
 0x6e6   :  { %v1779_v41 = vpop.f32.mrb[12].mxu1 }
 0x6e7   :  { %v1780_v20 = vadd.f32 %v1779_v41, %v1709_v18  ;;  %v3292_v21 = vpop.f32.mrb[13].mxu1 }
 0x6e8   :  { %3549 = vmatpush3.bf16.msra.mxu0 %v3546_v16 }
 0x6e9   :  { %v1783_v23 = vmul.f32 0.17677669, %v1780_v20 }
 0x6eb   :  { %3280 = vmatmul.mubr.msk.f32.vlgmr.msra.gmra.mrb[12].mxu0 %vm289_vm2, %v1494_v22  ;;  %v1879_v26 = vrot.slane %v1783_v23, %v4206_v12  ;;  %v1891_v12 = vmax.f32 %v1889_v43, %v1417_v40 }
 0x6ee   :  { %v3303_v25 = vpop.f32.mrb[14].mxu1 }
 0x6ef   :  { %v1873_v27 = vadd.f32 %v3303_v25, %v2933_v24  ;;  %v1867_v29 = vpop.f32.mrb[15].mxu1 }
 0x6f0   :  { %v1868_v30 = vadd.f32 %v2933_v24, %v1867_v29  ;;  %v2931_v29 = vld [vmem:[%s4546_s28] ss:$0 sm:$0xff] }
 0x6f1   :  { %v1881_v31 = vmul.f32 %v1879_v26, %v1873_v27 }
 0x6f2   :  { %v1880_v32 = vmul.f32 %v1879_v26, %v1868_v30 }
 0x6f3   :  { %v1885_v33 = vsel %vm289_vm2, %v1881_v31, 0.0 }
 0x6f4   :  { %1886 = vadd.xlane.f32.xlu1 %v1885_v33  ;;  %v1882_v34 = vsel %vm289_vm2, %v1880_v32, 0.0 }
 0x6f5   :  { %1883 = vadd.xlane.f32.xlu0 %v1882_v34 }
 0x781   :  { %v1887_v47 = vpop.xlane.xlu1 %1886 }
 0x782   :  { %v1893_v19 = vmax.f32 %v1891_v12, %v1887_v47  ;;  %v1884_v49 = vpop.xlane.xlu0 %1883 }
 0x783   :  { %v1892_v50 = vmax.f32 %v1890_v48, %v1884_v49 }
 0x784   :  { %v1895_v51 = vsub.f32 %v488_v7, %v1893_v19  ;;  %v1901_v52 = vsub.f32 %v947_v36, %v1893_v19  ;;  %v1907_v53 = vsub.f32 %v1417_v40, %v1893_v19  ;;  %v1913_v54 = vsub.f32 %v1887_v47, %v1893_v19 }
 0x785   :  { %v1894_v55 = vsub.f32 %v485_v35, %v1892_v50  ;;  %v1900_v56 = vsub.f32 %v944_v46, %v1892_v50  ;;  %v1906_v44 = vsub.f32 %v1414_v42, %v1892_v50  ;;  %v1912_v63 = vsub.f32 %v1884_v49, %v1892_v50 }
 0x786   :  { %v1898_v57 = vmul.f32 1.442695, %v1895_v51  ;;  %v1904_v58 = vmul.f32 1.442695, %v1901_v52  ;;  %v1910_v59 = vmul.f32 1.442695, %v1907_v53 }
 0x787   :  { %v1916_v60 = vmul.f32 1.442695, %v1913_v54  ;;  %v1896_v61 = vmul.f32 1.442695, %v1894_v55  ;;  %v1902_v62 = vmul.f32 1.442695, %v1900_v56 }
 0x788   :  { %3752 = vpow2.f32 %v1898_v57  ;;  %v1908_v39 = vmul.f32 1.442695, %v1906_v44  ;;  %v1914_v0 = vmul.f32 1.442695, %v1912_v63  ;;  %v1975_v54 = vld [vmem:[%s4064_s24 + $0x8] sm:$0xff]  ;;  %v1977_v56 = vld [vmem:[%s4064_s24 + $0x18] sm:$0xff] }
 0x789   :  { %3754 = vpow2.f32 %v1904_v58  ;;  %v1978_v58 = vld [vmem:[%s4064_s24 + $0x20] sm:$0xff] }
 0x78a   :  { %3756 = vpow2.f32 %v1910_v59  ;;  %v1979_v59 = vld [vmem:[%s4064_s24 + $0x28] sm:$0xff] }
 0x78b   :  { %3758 = vpow2.f32 %v1916_v60  ;;  %v1981_v60 = vld [vmem:[%s4064_s24 + $0x38] sm:$0xff] }
 0x78c   :  { %3760 = vpow2.f32 %v1896_v61  ;;  %v1982_v61 = vld [vmem:[%s4064_s24 + $0x40] sm:$0xff] }
 0x78d   :  { %3762 = vpow2.f32 %v1902_v62  ;;  %v1983_v62 = vld [vmem:[%s4064_s24 + $0x48] sm:$0xff] }
 0x78e   :  { %3764 = vpow2.f32 %v1908_v39  ;;  %v3580_v63 = vpack.c.bf16 %v1983_v62, %v1982_v61  ;;  %v1984_v39 = vld [vmem:[%s4064_s24 + $0x50] sm:$0xff] }
 0x78f   :  { %3766 = vpow2.f32 %v1914_v0  ;;  %v1985_v0 = vld [vmem:[%s4064_s24 + $0x58] sm:$0xff] }
 0x792   :  { %v3753_v1 = vpop.eup %3752 }
 0x793   :  { %v3755_v4 = vpop.eup %3754 }
 0x794   :  { %v3757_v6 = vpop.eup %3756  ;;  %v1919_v8 = vadd.f32 %v3755_v4, %v3753_v1 }
 0x795   :  { %v3759_v10 = vpop.eup %3758 }
 0x796   :  { %v3761_v11 = vpop.eup %3760  ;;  %v1921_v13 = vadd.f32 %v3757_v6, %v1919_v8 }
 0x797   :  { %v3763_v15 = vpop.eup %3762 }
 0x798   :  { %v1923_v16 = vadd.f32 %v3759_v10, %v1921_v13  ;;  %v1918_v17 = vadd.f32 %v3763_v15, %v3761_v11  ;;  %v3765_v18 = vpop.eup %3764 }
 0x799   :  { %v3767_v20 = vpop.eup %3766 }
 0x79a   :  { %3768 = vrcp.f32 %v1923_v16  ;;  %v1920_v41 = vadd.f32 %v3765_v18, %v1918_v17  ;;  %v1988_v16 = vld [vmem:[%s4064_s24 + $0x70] sm:$0xff]  ;;  %v1989_v17 = vld [vmem:[%s4064_s24 + $0x78] sm:$0xff] }
 0x79c   :  { %v1922_v21 = vadd.f32 %v3767_v20, %v1920_v41  ;;  %v2074_v41 = vld [vmem:[%s4547_s10] sm:$0xff] }
 0x79e   :  { %3770 = vrcp.f32 %v1922_v21  ;;  %v2076_v21 = vld [vmem:[%s4547_s10 + $0x10] sm:$0xff] }
 0x7a4   :  { %v3769_v22 = vpop.eup %3768 }
 0x7a5   :  { %v4340_v23 = vmul.f32 %v3769_v22, %v3753_v1  ;;  %v4342_v24 = vmul.f32 %v3769_v22, %v3759_v10  ;;  %v1935_v12 = vmul.f32 %v3769_v22, %v3757_v6  ;;  %v1931_v49 = vmul.f32 %v3769_v22, %v3755_v4  ;;  %v1986_v4 = vld [vmem:[%s4064_s24 + $0x60] sm:$0xff]  ;;  %v1987_v6 = vld [vmem:[%s4064_s24 + $0x68] sm:$0xff] }
 0x7a6   :  { %v3584_v1 = vpack.c.bf16 %v1985_v0, %v1984_v39  ;;  %v3588_v8 = vpack.c.bf16 %v1987_v6, %v1986_v4  ;;  %v2175_v39 = vld [vmem:[%s4548_s11 + $0x18] sm:$0xff]  ;;  %v2176_v6 = vld [vmem:[%s4548_s11 + $0x20] sm:$0xff] }
 0x7a7   :  { %v1937_v48 = vmul.f32 %v1935_v12, %v4297_v38  ;;  %v1933_v52 = vmul.f32 %v1931_v49, %v4239_v14  ;;  %v1976_v38 = vld [vmem:[%s4064_s24 + $0x10] sm:$0xff] }
 0x7a8   :  { %v3771_v25 = vpop.eup %3770  ;;  %v3568_v57 = vpack.c.bf16 %v1977_v56, %v1976_v38  ;;  %v1980_v14 = vld [vmem:[%s4064_s24 + $0x30] sm:$0xff]  ;;  %v2081_v56 = vld [vmem:[%s4547_s10 + $0x38] sm:$0xff] }
 0x7a9   :  { %v4344_v26 = vmul.f32 %v3771_v25, %v3767_v20  ;;  %v4346_v27 = vmul.f32 %v3771_v25, %v3761_v11  ;;  %v1934_v43 = vmul.f32 %v3771_v25, %v3765_v18  ;;  %v1930_v19 = vmul.f32 %v3771_v25, %v3763_v15  ;;  %v2075_v20 = vld [vmem:[%s4547_s10 + $0x8] sm:$0xff] }
 0x7aa   :  { %v3576_v44 = vpack.c.bf16 %v1981_v60, %v1980_v14  ;;  %v3592_v18 = vpack.c.bf16 %v1989_v17, %v1988_v16  ;;  %v3596_v25 = vpack.c.bf16 %v2075_v20, %v2074_v41  ;;  %v2268_v16 = vld [vmem:[%s4550_s16] sm:$0xf] }
 0x7ab   :  { %v1936_v47 = vmul.f32 %v1934_v43, %v4293_v45  ;;  %v1932_v51 = vmul.f32 %v1930_v19, %v4235_v9  ;;  %v1974_v45 = vld [vmem:[%s4064_s24] sm:$0xff]  ;;  %v3572_v9 = vpack.c.bf16 %v1979_v59, %v1978_v58  ;;  %s3879_s24 = smov 96   ;;  %v2173_v59 = vld [vmem:[%s4548_s11 + $0x8] sm:$0xff] }
 0x7ac   :  { %v3564_v55 = vpack.c.bf16 %v1975_v54, %v1974_v45  ;;  %3597 = vmatprep.subr.bf16.mxu1 %v3596_v25  ;;  %v2172_v58 = vld [vmem:[%s4548_s11] sm:$0xff] }
 0x7ad   :  { %v3732_v50 = vpack.i.bf16 %v1937_v48, %v1936_v47  ;;  %v3727_v53 = vpack.i.bf16 %v1933_v52, %v1932_v51  ;;  %3599 = vmatpush3.bf16.msra.mxu1 %v3596_v25  ;;  %v3776_v47 = vld [vmem:[%s3936_s14 + $0x8] sm:$0xff]  ;;  %v2269_v17 = vld [vmem:[%s4551_s9] sm:$0xf] }
 0x7ae   :  { %3565 = vmatprep.subr.bf16.mxu0 %v3564_v55  ;;  %v1929_v48 = vmul.f32 %v3776_v47, %v4340_v23  ;;  %v2278_v41 = vadd.s32 8, %v2269_v17  ;;  %v2937_v20 = vld [vmem:[%s4552_s18] ss:$0 sm:$0xff] }
 0x7af   :  { %3567 = vmatpush3.bf16.msra.mxu0 %v3564_v55  ;;  %v2080_v55 = vld [vmem:[%s4547_s10 + $0x30] sm:$0xff]  ;;  %v2950_v47 = vld [vmem:[%s4554_s12] ss:$0 sm:$0xff] }
 0x7b0   :  { %3569 = vmatprep.subr.bf16.mxu0 %v3568_v57 }
 0x7b3   :  { %3571 = vmatpush3.bf16.msra.mxu0 %v3568_v57  ;;  %v3608_v57 = vpack.c.bf16 %v2081_v56, %v2080_v55  ;;  %v2951_v55 = vld [vmem:[#allocation2] ss:$0 sm:$0xff] }
 0x7b4   :  { %3573 = vmatprep.subr.bf16.mxu0 %v3572_v9 }
 0x7b7   :  { %3575 = vmatpush3.bf16.msra.mxu0 %v3572_v9  ;;  %v3612_v9 = vpack.c.bf16 %v2173_v59, %v2172_v58 }
 0x7b8   :  { %3577 = vmatprep.subr.bf16.mxu0 %v3576_v44 }
 0x7bb   :  { %3579 = vmatpush3.bf16.msra.mxu0 %v3576_v44 }
 0x7bc   :  { %3581 = vmatprep.subr.bf16.mxu0 %v3580_v63 }
 0x7be   :  { %v3281_v30 = vpop.f32.mrb[12].mxu0 }
 0x7bf   :  { %v1675_v31 = vadd.f32 %v3281_v30, %v2931_v29  ;;  %v1658_v32 = vpop.f32.mrb[13].mxu0  ;;  %3583 = vmatpush3.bf16.msra.mxu0 %v3580_v63  ;;  %v2174_v63 = vld [vmem:[%s4548_s11 + $0x10] sm:$0xff] }
 0x7c0   :  { %v1674_v33 = vadd.f32 %v2931_v29, %v1658_v32  ;;  %3585 = vmatprep.subr.bf16.mxu0 %v3584_v1  ;;  %v2077_v29 = vld [vmem:[%s4547_s10 + $0x18] sm:$0xff]  ;;  %v3616_v4 = vpack.c.bf16 %v2175_v39, %v2174_v63 }
 0x7c1   :  { %vm1677_vm7 = vcmp.ge.f32.partialorder %v1675_v31, 0.0  ;;  %v1679_v34 = vmul.f32 0.01, %v1675_v31  ;;  %v3600_v32 = vpack.c.bf16 %v2077_v29, %v2076_v21  ;;  %v2645_v39 = vld [vmem:[%s4557_s13 + $0x18] sm:$0xff] }
 0x7c2   :  { %vm1676_vm8 = vcmp.ge.f32.partialorder %v1674_v33, 0.0  ;;  %v1678_v46 = vmul.f32 0.01, %v1674_v33 }
 0x7c3   :  { %v4349_v35 = vsel %vm1677_vm7, %v1675_v31, %v1679_v34  ;;  %3587 = vmatpush3.bf16.msra.mxu0 %v3584_v1  ;;  %v2079_v34 = vld [vmem:[%s4547_s10 + $0x28] sm:$0xff]  ;;  %3601 = vmatprep.subr.bf16.mxu1 %v3600_v32 }
 0x7c4   :  { %v1683_v36 = vmul.f32 %v4349_v35, %v4349_v35  ;;  %v4353_v7 = vsel %vm1676_vm8, %v1674_v33, %v1678_v46  ;;  %3589 = vmatprep.subr.bf16.mxu0 %v3588_v8  ;;  %v2078_v33 = vld [vmem:[%s4547_s10 + $0x20] sm:$0xff]  ;;  %3603 = vmatpush3.bf16.msra.mxu1 %v3600_v32 }
 0x7c5   :  { %v1682_v37 = vmul.f32 %v4353_v7, %v4353_v7  ;;  %v2940_v32 = vld [vmem:[%s4553_s22] ss:$0 sm:$0xff] }
 0x7c6   :  { %v1687_v40 = vsel %vm289_vm2, %v1683_v36, 0.0 }
 0x7c7   :  { %1688 = vadd.xlane.f32.xlu1 %v1687_v40  ;;  %v1684_v42 = vsel %vm289_vm2, %v1682_v37, 0.0  ;;  %3591 = vmatpush3.bf16.msra.mxu0 %v3588_v8  ;;  %v3604_v40 = vpack.c.bf16 %v2079_v34, %v2078_v33  ;;  %v2177_v8 = vld [vmem:[%s4548_s11 + $0x28] sm:$0xff]  ;;  %v2271_v33 = vand.u32 127, %v477_v2 }
 0x7c8   :  { %1685 = vadd.xlane.f32.xlu0 %v1684_v42  ;;  %3593 = vmatprep.subr.bf16.mxu0 %v3592_v18 }
 0x7c9   :  { %3605 = vmatprep.subr.bf16.mxu1 %v3604_v40 }
 0x7ca   :  { %3607 = vmatpush3.bf16.msra.mxu1 %v3604_v40 }
 0x7cb   :  { %3595 = vmatpush3.bf16.msra.mxu0 %v3592_v18  ;;  %3609 = vmatprep.subr.bf16.mxu1 %v3608_v57  ;;  %v3880_v18 = vmov 0  }
 0x7cc   :  { %3628 = vmatprep.subr.bf16.mxu0 %v3874_v3  ;;  %3742 = vset.pattern.permute.xlu1 %v3880_v18 }
 0x7cd   :  { %3743 = vset.pattern.permute.xlu0 %v3880_v18 }
 0x7ce   :  { %3611 = vmatpush3.bf16.msra.mxu1 %v3608_v57 }
 0x7cf   :  { %3613 = vmatprep.subr.bf16.mxu1 %v3612_v9 }
 0x7d8   :  { %3733 = vrot.lane.b32.xlu1 %v3732_v50, %s3877_s2 }
 0x7de   :  { %3728 = vrot.lane.b32.xlu0 %v3727_v53, %s3878_s15 }
 0x7e2   :  { %2280 = vperm.xlu0 %3743, %v2278_v41   ;;  %v2731_v41 = vld [vmem:[%s4114_s7] sm:$0xff] }
 0x854   :  { %v1689_v10 = vpop.xlane.xlu1 %1688 }
 0x855   :  { %v1691_v11 = vmax.f32 %v1689_v10, 1e-24  ;;  %v1686_v13 = vpop.xlane.xlu0 %1685  ;;  %v3620_v10 = vpack.c.bf16 %v2177_v8, %v2176_v6 }
 0x856   :  { %v1690_v15 = vmax.f32 %v1686_v13, 1e-24  ;;  %v2179_v13 = vld [vmem:[%s4548_s11 + $0x38] sm:$0xff] }
 0x857   :  { %3772 = vrsqrt.f32 %v1691_v11  ;;  %v2178_v11 = vld [vmem:[%s4548_s11 + $0x30] sm:$0xff] }
 0x858   :  { %3774 = vrsqrt.f32 %v1690_v15  ;;  %v3624_v15 = vpack.c.bf16 %v2179_v13, %v2178_v11 }
 0x861   :  { %v3773_v22 = vpop.eup %3772 }
 0x862   :  { %v3775_v30 = vpop.eup %3774  ;;  %v1695_v31 = vmul.f32 %v3773_v22, %v4349_v35  ;;  %v3729_v35 = vpop.permute.xlu0 %3728 }
 0x863   :  { %v1694_v46 = vmul.f32 %v3775_v30, %v4353_v7  ;;  %v3731_v43 = vunpack.i.h.bf16 %v3729_v35  ;;  %v3730_v12 = vunpack.i.l.bf16 %v3729_v35  ;;  %v3734_v7 = vpop.permute.xlu1 %3733 }
 0x864   :  { %v1941_v36 = vmul.f32 %v4342_v24, %v1695_v31  ;;  %v3777_v24 = vld [vmem:[%s3936_s14] sm:$0xff]  ;;  %v3736_v50 = vunpack.i.h.bf16 %v3734_v7  ;;  %v3735_v51 = vunpack.i.l.bf16 %v3734_v7  ;;  %s4549_s14 = sld [smem:[#allocation29_spill]] }
 0x865   :  { %v1940_v37 = vmul.f32 %v4344_v26, %v1694_v46  ;;  %v1928_v19 = vmul.f32 %v3777_v24, %v4346_v27  ;;  %v1967_v26 = vsel %vm289_vm2, %v1929_v48, %v3731_v43 }
 0x866   :  { %v1970_v27 = vsel %vm1968_vm9, %v1967_v26, %v3736_v50 }
 0x867   :  { %v3737_v42 = vpack.i.bf16 %v1941_v36, %v1940_v37  ;;  %v1966_v49 = vsel %vm289_vm2, %v1928_v19, %v3730_v12  ;;  %v2281_v36 = vpop.permute.xlu0 %2280 }
 0x868   :  { %v1969_v23 = vsel %vm1968_vm9, %v1966_v49, %v3735_v51  ;;  %vm2282_vm12 = vcmp.eq.s32.totalorder %v2271_v33, %v2281_v36  ;;  %v2949_v49 = vld [vmem:[%s4555_s26] ss:$0 sm:$0xff] }
 0x869   :  { %3738 = vrot.lane.b32.xlu1 %v3737_v42, %s3879_s24  ;;  %v2944_v7 = vsel %vm2282_vm12, 1.0, %v3876_v5 }
 0x86a   :  { %v2936_v14 = vld [vmem:[%s4549_s14] ss:$0 sm:$0xff] }
 0x86d   :  { %2273 = vperm.xlu1 %3742, %v2268_v16   ;;  %v2648_v16 = vld [vmem:[%s4557_s13 + $0x30] sm:$0xff] }
 0x871   :  { %2286 = vperm.xlu1 %3742, %v2269_v17   ;;  %v2649_v17 = vld [vmem:[%s4557_s13 + $0x38] sm:$0xff] }
 0x872   :  { %v3650_v18 = vpack.c.bf16 %v2649_v17, %v2648_v16 }
 0x8db   :  { %v3739_v52 = vpop.permute.xlu1 %3738 }
 0x8dc   :  { %v3741_v53 = vunpack.i.h.bf16 %v3739_v52  ;;  %v3740_v45 = vunpack.i.l.bf16 %v3739_v52 }
 0x8de   :  { %v1972_v54 = vsel %vm1971_vm10, %v1969_v23, %v3740_v45  ;;  %v1973_v38 = vsel %vm1971_vm10, %v1970_v27, %v3741_v53  ;;  %v2557_v23 = vld [vmem:[%s4556_s0] sm:$0xff]  ;;  %v2558_v27 = vld [vmem:[%s4556_s0 + $0x8] sm:$0xff] }
 0x8df   :  { %3336 = vmatprep.mubr.f32.mxu0 %v1972_v54  ;;  %v3635_v54 = vpack.c.bf16 %v2558_v27, %v2557_v23 }
 0x8e0   :  { %3337 = vmatmul.mubr.f32.vlgmr.msra.gmra.mrb[14].mxu0 %v1973_v38 }
 0x8e1   :  { %3381 = vmatprep.mubr.msk.f32.mxu0 %vm3875_vm0, %v3876_v5 }
 0x8ec   :  { %v2274_v34 = vpop.permute.xlu1 %2273 }
 0x8ed   :  { %vm2275_vm11 = vcmp.eq.s32.totalorder %v2271_v33, %v2274_v34 }
 0x8ee   :  { %v2943_v43 = vsel %vm2275_vm11, 1.0, %v3876_v5 }
 0x8f0   :  { %v2287_v12 = vpop.permute.xlu1 %2286 }
 0x8f1   :  { %vm2288_vm13 = vcmp.eq.s32.totalorder %v2271_v33, %v2287_v12 }
 0x8f2   :  { %v2945_v2 = vsel %vm2288_vm13, 1.0, %v3876_v5 }
 0x9b3   :  { %v3338_v60 = vpop.f32.mrb[14].mxu0 }
 0x9b4   :  { %v2069_v44 = vadd.f32 %v3338_v60, %v2936_v14  ;;  %v2063_v61 = vpop.f32.mrb[15].mxu0 }
 0x9b5   :  { %v2064_v62 = vadd.f32 %v2936_v14, %v2063_v61  ;;  %v2560_v14 = vld [vmem:[%s4556_s0 + $0x18] sm:$0xff]  ;;  %v2643_v61 = vld [vmem:[%s4557_s13 + $0x8] sm:$0xff] }
 0x9b6   :  { %v2073_v1 = vmax.f32 %v2069_v44, 0.0  ;;  %v2642_v44 = vld [vmem:[%s4557_s13] sm:$0xff] }
 0x9b7   :  { %v2072_v0 = vmax.f32 %v2064_v62, 0.0  ;;  %v2644_v62 = vld [vmem:[%s4557_s13 + $0x10] sm:$0xff]  ;;  %v3641_v63 = vpack.c.bf16 %v2643_v61, %v2642_v44 }
 0x9b9   :  { %3355 = vmatprep.mubr.msk.f32.mxu1 %vm1968_vm9, %v2072_v0  ;;  %v3644_v0 = vpack.c.bf16 %v2645_v39, %v2644_v62 }
 0x9ba   :  { %3356 = vmatmul.mubr.msk.f32.vlgmr.msra.gmra.mrb[16].mxu1 %vm1968_vm9, %v2073_v1  ;;  %v2646_v1 = vld [vmem:[%s4557_s13 + $0x20] sm:$0xff] }
 0x9bb   :  { %3615 = vmatpush3.bf16.msra.mxu1 %v3612_v9  ;;  %v2559_v9 = vld [vmem:[%s4556_s0 + $0x10] sm:$0xff] }
 0x9bc   :  { %3617 = vmatprep.subr.bf16.mxu1 %v3616_v4  ;;  %v3638_v60 = vpack.c.bf16 %v2560_v14, %v2559_v9 }
 0x9bf   :  { %3619 = vmatpush3.bf16.msra.mxu1 %v3616_v4  ;;  %v2647_v4 = vld [vmem:[%s4557_s13 + $0x28] sm:$0xff] }
 0x9c0   :  { %3621 = vmatprep.subr.bf16.mxu1 %v3620_v10  ;;  %v3647_v6 = vpack.c.bf16 %v2647_v4, %v2646_v1 }
 0x9c3   :  { %3623 = vmatpush3.bf16.msra.mxu1 %v3620_v10 }
 0x9c4   :  { %3625 = vmatprep.subr.bf16.mxu1 %v3624_v15 }
 0x9c7   :  { %3627 = vmatpush3.bf16.msra.mxu1 %v3624_v15 }
 0x9c8   :  { %3631 = vmatprep.subr.bf16.mxu1 %v3874_v3 }
 0xa8d   :  { %v3357_v21 = vpop.f32.mrb[16].mxu1 }
 0xa8e   :  { %v2167_v22 = vadd.f32 %v3357_v21, %v2937_v20  ;;  %v2161_v25 = vpop.f32.mrb[17].mxu1  ;;  %v2733_v21 = vld [vmem:[%s4114_s7 + $0x10] sm:$0xff] }
 0xa8f   :  { %v2162_v29 = vadd.f32 %v2937_v20, %v2161_v25  ;;  %v2732_v20 = vld [vmem:[%s4114_s7 + $0x8] sm:$0xff]  ;;  %v2734_v25 = vld [vmem:[%s4114_s7 + $0x18] sm:$0xff] }
 0xa90   :  { %v2171_v31 = vmax.f32 %v2167_v22, 0.0  ;;  %v3653_v22 = vpack.c.bf16 %v2732_v20, %v2731_v41 }
 0xa91   :  { %v2170_v30 = vmax.f32 %v2162_v29, 0.0  ;;  %v3656_v29 = vpack.c.bf16 %v2734_v25, %v2733_v21 }
 0xa93   :  { %3374 = vmatprep.mubr.msk.f32.mxu1 %vm1968_vm9, %v2170_v30  ;;  %v2735_v30 = vld [vmem:[%s4114_s7 + $0x20] sm:$0xff] }
 0xa94   :  { %3375 = vmatmul.mubr.msk.f32.vlgmr.msra.gmra.mrb[18].mxu1 %vm1968_vm9, %v2171_v31  ;;  %v2736_v31 = vld [vmem:[%s4114_s7 + $0x28] sm:$0xff] }
 0xa95   :  { %3388 = vmatprep.mubr.msk.f32.mxu1 %vm3875_vm0, %v3876_v5 }
 0xb67   :  { %v3376_v46 = vpop.f32.mrb[18].mxu1 }
 0xb68   :  { %v2265_v37 = vadd.f32 %v3376_v46, %v2940_v32  ;;  %v2259_v40 = vpop.f32.mrb[19].mxu1 }
 0xb69   :  { %v2260_v42 = vadd.f32 %v2940_v32, %v2259_v40  ;;  %v2952_v32 = vld [vmem:[%s4558_s17] ss:$0 sm:$0xff]  ;;  %v2738_v40 = vld [vmem:[%s4114_s7 + $0x38] sm:$0xff] }
 0xb6b   :  { %v3629_v35 = vpack.c.bf16 %v2265_v37, %v2260_v42  ;;  %v2737_v37 = vld [vmem:[%s4114_s7 + $0x30] sm:$0xff] }
 0xb6c   :  { %v3662_v42 = vpack.c.bf16 %v2738_v40, %v2737_v37 }
 0xb6d   :  { %3630 = vmatpush3.bf16.msra.mxu0 %v3629_v35  ;;  %3633 = vmatpush3.bf16.msra.mxu1 %v3629_v35  ;;  %v2954_v35 = vld [vmem:[%s4559_s21] ss:$0 sm:$0xff] }
 0xb6e   :  { %3391 = vmatprep.subr.mxu0 %v3876_v5  ;;  %3634 = vmatprep.subr.bf16.mxu1 %v3874_v3 }
 0xb70   :  { %3382 = vmatmul.mubr.msk.f32.vlgmr.msra.gmra.mrb[16].mxu0 %vm215_vm1, %v2943_v43  ;;  %3389 = vmatmul.mubr.msk.f32.vlgmr.msra.gmra.mrb[20].mxu1 %vm215_vm1, %v2944_v7 }
 0xb71   :  { %3392 = vmatpush3.msra.mxu0 %v4162_v28  ;;  %3393 = vmatprep.mubr.msk.f32.mxu0 %vm3875_vm0, %v3876_v5 }
 0xb72   :  { %3404 = vmatprep.mubr.msk.f32.mxu1 %vm3875_vm0, %v3876_v5  ;;  %3640 = vmatprep.subr.bf16.mxu0 %v3874_v3 }
 0xb73   :  { %3636 = vmatpush3.bf16.msra.mxu1 %v3635_v54 }
 0xb74   :  { %3394 = vmatmul.mubr.msk.f32.vlgmr.msra.gmra.mrb[18].mxu0 %vm2437_vm14, %v2945_v2  ;;  %3637 = vmatprep.subr.bf16.mxu1 %v3874_v3 }
 0xb75   :  { %3423 = vmatprep.mubr.msk.f32.mxu0 %vm3875_vm0, %v3876_v5  ;;  %3642 = vmatpush3.bf16.msra.mxu0 %v3641_v63 }
 0xb76   :  { %3643 = vmatprep.subr.bf16.mxu0 %v3874_v3 }
 0xb77   :  { %3639 = vmatpush3.bf16.msra.mxu1 %v3638_v60 }
 0xb78   :  { %3652 = vmatprep.subr.bf16.mxu1 %v3874_v3 }
 0xb79   :  { %3645 = vmatpush3.bf16.msra.mxu0 %v3644_v0 }
 0xb7a   :  { %3646 = vmatprep.subr.bf16.mxu0 %v3874_v3 }
 0xb7d   :  { %3648 = vmatpush3.bf16.msra.mxu0 %v3647_v6 }
 0xb7e   :  { %3649 = vmatprep.subr.bf16.mxu0 %v3874_v3 }
 0xb81   :  { %3651 = vmatpush3.bf16.msra.mxu0 %v3650_v18 }
 0xc43   :  { %v2360_v28 = vpop.f32.mrb[16].mxu0  ;;  %v2433_v48 = vpop.f32.mrb[20].mxu1 }
 0xc44   :  { %v3383_v24 = vpop.f32.mrb[17].mxu0  ;;  %v2530_v19 = vmul.f32 %v2950_v47, %v2433_v48  ;;  %v3390_v26 = vpop.f32.mrb[21].mxu1  ;;  %2819 = vst.msk [vmem:[#allocation3] sm:$0xf] %vm2519_vm15, %v2360_v28 }
 0xc46   :  { %v2531_v50 = vsel %vm2519_vm15, %v2530_v19, 0.0 }
 0xc47   :  { %v2507_v51 = vpop.f32.mrb[18].mxu0  ;;  %2532 = vadd.xlane.f32.xlu0 %v2531_v50 }
 0xc48   :  { %v2518_v52 = vmul.f32 %v2949_v49, %v2507_v51  ;;  %v3395_v53 = vpop.f32.mrb[19].mxu0 }
 0xc4a   :  { %v2520_v45 = vsel %vm2519_vm15, %v2518_v52, 0.0 }
 0xc4b   :  { %2521 = vadd.xlane.f32.xlu1 %v2520_v45 }
 0xcd4   :  { %v2533_v38 = vpop.xlane.xlu0 %2532 }
 0xcd8   :  { %v2522_v56 = vpop.xlane.xlu1 %2521 }
 0xcd9   :  { %v2534_v57 = vadd.f32 %v2533_v38, %v2522_v56 }
 0xcdb   :  { %v2542_v58 = vadd.f32 %v2951_v55, %v2534_v57 }
 0xcdd   :  { %2545 = vperm.xlu0 %3743, %v2542_v58   ;;  %v2549_v59 = vsub.f32 1.0, %v2542_v58 }
 0xcdf   :  { %2552 = vperm.xlu1 %3742, %v2549_v59  }
 0xd5c   :  { %v2546_v8 = vpop.permute.xlu0 %2545 }
 0xd5d   :  { %v2548_v11 = vmul.f32 %v2546_v8, %v2433_v48 }
 0xd5e   :  { %v2553_v10 = vpop.permute.xlu1 %2552 }
 0xd5f   :  { %v2555_v13 = vmul.f32 %v2553_v10, %v2507_v51 }
 0xd61   :  { %v2556_v15 = vadd.f32 %v2555_v13, %v2548_v11 }
 0xd63   :  { %3405 = vmatmul.mubr.msk.f32.vlgmr.msra.gmra.mrb[22].mxu1 %vm289_vm2, %v2556_v15 }
 0xd64   :  { %3442 = vmatprep.mubr.msk.f32.mxu1 %vm3875_vm0, %v3876_v5  ;;  %3654 = vmatpush3.bf16.msra.mxu1 %v3653_v22  ;;  %v3659_v5 = vpack.c.bf16 %v2736_v31, %v2735_v30 }
 0xd65   :  { %3655 = vmatprep.subr.bf16.mxu1 %v3874_v3 }
 0xd68   :  { %3657 = vmatpush3.bf16.msra.mxu1 %v3656_v29 }
 0xd69   :  { %3658 = vmatprep.subr.bf16.mxu1 %v3874_v3 }
 0xd6c   :  { %3660 = vmatpush3.bf16.msra.mxu1 %v3659_v5 }
 0xd6d   :  { %3661 = vmatprep.subr.bf16.mxu1 %v3874_v3 }
 0xd70   :  { %3663 = vmatpush3.bf16.msra.mxu1 %v3662_v42 }
 0xe36   :  { %v2637_v33 = vpop.f32.mrb[22].mxu1 }
 0xe37   :  { %v2638_v34 = vadd.f32 %v2952_v32, %v2637_v33  ;;  %v3406_v46 = vpop.f32.mrb[23].mxu1 }
 0xe39   :  { %v2641_v36 = vmax.f32 %v2638_v34, 0.0 }
 0xe3b   :  { %3424 = vmatmul.mubr.msk.f32.vlgmr.msra.gmra.mrb[20].mxu0 %vm1968_vm9, %v2641_v36 }
 0xf0e   :  { %v2726_v43 = vpop.f32.mrb[20].mxu0 }
 0xf0f   :  { %v2727_v12 = vadd.f32 %v2954_v35, %v2726_v43  ;;  %v3425_v7 = vpop.f32.mrb[21].mxu0 }
 0xf11   :  { %v2730_v2 = vmax.f32 %v2727_v12, 0.0 }
 0xf13   :  { %3443 = vmatmul.mubr.msk.f32.vlgmr.msra.gmra.mrb[24].mxu1 %vm1968_vm9, %v2730_v2 }
 0xf14   :  { %3789 = shalt.err (!%p3786_p4)
}
 0xf15   :  { %s3790_s7 = scalar_lea.hbm %s4122_s23, 64 }
 0xf16   :  { %p3791_p5 = scmp.ne.s32.totalorder %s4122_s23, %s3790_s7  ;;  %p3794_p6 = scmp.lt.u32.totalorder %s3790_s7, %s4122_s23 }
 0xf18   :  { %p3796_p7 = pnand %p3794_p6, %p3791_p5 }
 0xf1a   :  { %3799 = shalt.err (!%p3796_p7)
}
 0xf1b   :  { %s4560_s8 = sld [smem:[#allocation38_spill]]  ;;  %s3882_s19 = smov [#allocation5]  }
 0xf1c   :  { %2830 = dma.vmem_to_hbm [thread:$0]  %s2828_s29, 64, %s4122_s23, [#allocation4]  }
 0xf1d   :  { %s2837_s30 = sshll.u32 %s3882_s19, 4  ;;  %s2838_s30 = int_to_ptr.vmem [resolvable:$true] %s2837_s30 }
 0xf1e   :  { %s3800_s6 = scalar_lea.vmem %s2838_s30, 64  ;;  %p3805_p9 = scmp.lt.s32.totalorder %s2838_s30, %s2838_s30 }
 0xf1f   :  { %p3801_p8 = scmp.ne.s32.totalorder %s2838_s30, %s3800_s6  ;;  %p3806_p10 = scmp.lt.s32.totalorder %s3800_s6, %s3800_s6 }
 0xf21   :  { %v2956_v3 = vld [vmem:[%s4560_s8] ss:$0 sm:$0xff]  ;;  %p3807_p11 = por %p3806_p10, %p3805_p9 }
 0xf23   :  { %p3808_p12 = pnand %p3807_p11, %p3801_p8 }
 0xfe6   :  { %v2815_v47 = vpop.f32.mrb[24].mxu1 }
 0xfe7   :  { %v2816_v28 = vadd.f32 %v2956_v3, %v2815_v47  ;;  %v3444_v48 = vpop.f32.mrb[25].mxu1 }
 0xfe9   :  { %2820 = vst.msk [vmem:[#allocation5] sm:$0xf] %vm2519_vm15, %v2816_v28 }
 0xfea   :  { %3811 = shalt.err (!%p3808_p12)
}
 0xfeb   :  { %s3812_s23 = scalar_lea.hbm %s4127_s1, 64 }
 0xfec   :  { %p3813_p13 = scmp.ne.s32.totalorder %s4127_s1, %s3812_s23  ;;  %p3816_p0 = scmp.lt.u32.totalorder %s3812_s23, %s4127_s1 }
 0xfee   :  { %p3818_p1 = pnand %p3816_p0, %p3813_p13 }
 0xff0   :  { %3821 = shalt.err (!%p3818_p1)
}
 0xff1   :  { %2840 = dma.vmem_to_hbm [thread:$0]  %s2838_s30, 64, %s4127_s1, [#allocation6]  }
 0xff2   :  { %3822 = dma.done.wait [#allocation4], 64  }
 0xff3   :  { %3823 = vsyncadd [#allocation4], 4294967232 }
 0xff4   :  { %3824 = dma.done.wait [#allocation6], 64  }
 0xff5   :  { %3825 = vsyncadd [#allocation6], 4294967232 }
 0xff6   :  { %2847 = vsyncpa [#allocation4], 1 }
 0xff7   :  { %2848 = vsyncpa [#allocation6], 1 }

</bundles_post_ra>
